<compile_context>
chip_gen: v5e
topology: v5e:2x2
jax: 0.10.0
libtpu: 0.0.40
codegen_flags: <defaults>
</compile_context>

<pallas_src>
import math
import jax
import jax.numpy as jnp
from jax import lax
from jax.experimental import pallas as pl
from jax.experimental.pallas import tpu as pltpu

EPS = 1e-8      # _norm_no_nan clamp
LN_EPS = 1e-5   # nn.LayerNorm default eps


def _round_up(x, m):
    return ((x + m - 1) // m) * m


# ---------------------------------------------------------------------------
# In-kernel building blocks
# ---------------------------------------------------------------------------
def _gvp_apply(s_segs, v_segs, p, use_acts):
    """GVP on a row tile.

    s_segs : list of (R, w_i) scalar-feature segments.
    v_segs : [vx_segs, vy_segs, vz_segs]; each a list of (R, u_j) segments.
    p      : dict with 'wh' (list), 'wv', 'ws_s' (list), 'ws_v', 'b'.
    Returns s_out (R, so) and [vx, vy, vz] each (R, vo).
    """
    vh = []
    for c in range(3):
        acc = None
        for seg, w in zip(v_segs[c], p['wh']):
            t = jnp.dot(seg, w, preferred_element_type=jnp.float32)
            acc = t if acc is None else acc + t
        vh.append(acc)
    vn = jnp.sqrt(jnp.maximum(vh[0] ** 2 + vh[1] ** 2 + vh[2] ** 2, EPS))
    s_out = p['b']
    for seg, w in zip(s_segs, p['ws_s']):
        s_out = s_out + jnp.dot(seg, w, preferred_element_type=jnp.float32)
    s_out = s_out + jnp.dot(vn, p['ws_v'], preferred_element_type=jnp.float32)
    v_out = [jnp.dot(vh[c], p['wv'], preferred_element_type=jnp.float32)
             for c in range(3)]
    if use_acts:
        n2 = jnp.maximum(v_out[0] ** 2 + v_out[1] ** 2 + v_out[2] ** 2, EPS)
        gate = jax.nn.sigmoid(jnp.sqrt(n2))          # (R, vo), broadcast per comp
        v_out = [vc * gate for vc in v_out]
        s_out = jax.nn.relu(s_out)
    return s_out, v_out


def _layernorm_apply(s, v, w, b):
    """Combined LayerNorm on (s, [vx,vy,vz]); rsqrt on the EUP, no divides."""
    mu = jnp.mean(s, axis=-1, keepdims=True)
    var = jnp.mean((s - mu) ** 2, axis=-1, keepdims=True)
    s_out = (s - mu) * lax.rsqrt(var + LN_EPS) * w + b
    vn2 = jnp.maximum(v[0] ** 2 + v[1] ** 2 + v[2] ** 2, EPS)   # (R, nv)
    inv = lax.rsqrt(jnp.mean(vn2, axis=-1, keepdims=True))       # (R, 1)
    return s_out, [vc * inv for vc in v]


def _read_gvp(it, n_vseg, n_sseg):
    """Rebuild a split-GVP parameter dict from an iterator of VMEM refs."""
    wh = [next(it)[...] for _ in range(n_vseg)]
    wv = next(it)[...]
    ws_s = [next(it)[...] for _ in range(n_sseg)]
    ws_v = next(it)[...]
    b = next(it)[...]
    return dict(wh=wh, wv=wv, ws_s=ws_s, ws_v=ws_v, b=b)


# ---------------------------------------------------------------------------
# Kernel 1: per-edge message function (3 GVPs) + scatter-mean aggregation
#           (gather + scatter via scalar-prefetched indices, VMEM accumulator)
# ---------------------------------------------------------------------------
_N_MSG_WEIGHTS = (3 + 1 + 3 + 1 + 1) + 5 + 5  # GVP1 split into 3 segments, GVP2, GVP3


def make_message_kernel(ns, nv, es, ev, edge_tile, n_edges):
    n_w = _N_MSG_WEIGHTS

    def kernel(*refs):
        src_ref, dst_ref = refs[0], refs[1]                 # SMEM (scalar prefetch)
        x_ref, e_ref, inv_ref = refs[2], refs[3], refs[4]   # VMEM
        wrefs = refs[5:5 + n_w]
        dh_ref = refs[5 + n_w]
        acc_ref, msrc_ref, mdst_ref, mrow_ref = refs[6 + n_w:]

        t = pl.program_id(0)
        n_tiles = pl.num_programs(0)

        @pl.when(t == 0)
        def _init():
            acc_ref[...] = jnp.zeros_like(acc_ref)

        # ---- gather node rows for this edge tile (indices from SMEM) -------
        def gather_one(e, carry):
            g = t * edge_tile + e
            si = src_ref[g]
            di = dst_ref[g]
            msrc_ref[pl.ds(e, 1), :] = x_ref[pl.ds(si, 1), :]
            mdst_ref[pl.ds(e, 1), :] = x_ref[pl.ds(di, 1), :]
            return carry
        lax.fori_loop(0, edge_tile, gather_one, 0)

        it = iter(wrefs)
        p1 = _read_gvp(it, 3, 3)   # first GVP split by input segment
        p2 = _read_gvp(it, 1, 1)
        p3 = _read_gvp(it, 1, 1)

        ms = msrc_ref[...]         # (TE, ns + 3*nv)  == x[src]
        md = mdst_ref[...]         # (TE, ns + 3*nv)  == x[dst]
        ea = e_ref[...]            # (TE, es + 3*ev)  edge attributes (tiled input)

        # tuple_cat((s_j, v_j), edge_attr, (s_i, v_i)) without materializing it:
        # segment lists + split weights reproduce the concatenated matmul.
        s_segs = [ms[:, :ns], ea[:, :es], md[:, :ns]]
        v_segs = [[ms[:, ns + c * nv: ns + (c + 1) * nv],
                   ea[:, es + c * ev: es + (c + 1) * ev],
                   md[:, ns + c * nv: ns + (c + 1) * nv]] for c in range(3)]

        s, v = _gvp_apply(s_segs, v_segs, p1, True)
        s, v = _gvp_apply([s], [[v[0]], [v[1]], [v[2]]], p2, True)
        s, v = _gvp_apply([s], [[v[0]], [v[1]], [v[2]]], p3, False)

        # one lane-dense merged row per edge for the scatter
        mrow_ref[...] = jnp.concatenate([s, v[0], v[1], v[2]], axis=-1)

        # ---- scatter-sum into the per-node VMEM accumulator -----------------
        def scatter_one(e, carry):
            g = t * edge_tile + e
            d = dst_ref[g]
            w = jnp.where(g < n_edges, 1.0, 0.0)   # mask padded edges
            acc_ref[pl.ds(d, 1), :] = (acc_ref[pl.ds(d, 1), :]
                                       + w * mrow_ref[pl.ds(e, 1), :])
            return carry
        lax.fori_loop(0, edge_tile, scatter_one, 0)

        # ---- finalize: scatter-mean = sum * (1/deg), written once -----------
        @pl.when(t == n_tiles - 1)
        def _finish():
            dh_ref[...] = acc_ref[...] * inv_ref[...]

    return kernel


# ---------------------------------------------------------------------------
# Kernel 2: residual + LayerNorm + feedforward (2 GVPs) + residual + LayerNorm
#           gridded over node tiles ("parallel")
# ---------------------------------------------------------------------------
def make_node_kernel(ns, nv):
    def kernel(*refs):
        x_ref, dh_ref = refs[0], refs[1]
        ln0_w, ln0_b = refs[2][...], refs[3][...]
        it = iter(refs[4:14])
        f1 = _read_gvp(it, 1, 1)
        f2 = _read_gvp(it, 1, 1)
        ln1_w, ln1_b = refs[14][...], refs[15][...]
        out_ref = refs[16]

        x = x_ref[...]
        dh = dh_ref[...]
        s = x[:, :ns] + dh[:, :ns]
        v = [x[:, ns + c * nv: ns + (c + 1) * nv]
             + dh[:, ns + c * nv: ns + (c + 1) * nv] for c in range(3)]

        # x = norm[0](x + dropout(dh))   (eval-mode dropout == identity)
        s, v = _layernorm_apply(s, v, ln0_w, ln0_b)

        # feedforward: 2 GVPs
        fs, fv = _gvp_apply([s], [[v[0]], [v[1]], [v[2]]], f1, True)
        fs, fv = _gvp_apply([fs], [[fv[0]], [fv[1]], [fv[2]]], f2, False)

        # x = norm[1](x + dropout(ff(x)))
        s = s + fs
        v = [v[c] + fv[c] for c in range(3)]
        s, v = _layernorm_apply(s, v, ln1_w, ln1_b)

        out_ref[...] = jnp.concatenate([s, v[0], v[1], v[2]], axis=-1)

    return kernel


# ---------------------------------------------------------------------------
# pallas_call wrappers
# ---------------------------------------------------------------------------
def run_message_kernel(src, dst, x_m, e_m, inv_deg, msg_flat,
                       ns, nv, es, ev, edge_tile, n_edges):
    n_pad, dn = x_m.shape
    e_pad, de = e_m.shape
    n_tiles = e_pad // edge_tile

    def const_spec(shape):  # full-array block, resident across the grid
        return pl.BlockSpec(shape, lambda i, *_: (0,) * len(shape))

    in_specs = ([const_spec(x_m.shape),
                 pl.BlockSpec((edge_tile, de), lambda i, *_: (i, 0)),
                 const_spec(inv_deg.shape)]
                + [const_spec(w.shape) for w in msg_flat])

    grid_spec = pltpu.PrefetchScalarGridSpec(
        num_scalar_prefetch=2,
        grid=(n_tiles,),
        in_specs=in_specs,
        out_specs=const_spec((n_pad, dn)),
        scratch_shapes=[pltpu.VMEM((n_pad, dn), jnp.float32),       # accumulator
                        pltpu.VMEM((edge_tile, dn), jnp.float32),   # gathered src rows
                        pltpu.VMEM((edge_tile, dn), jnp.float32),   # gathered dst rows
                        pltpu.VMEM((edge_tile, dn), jnp.float32)])  # merged messages

    kernel = make_message_kernel(ns, nv, es, ev, edge_tile, n_edges)
    return pl.pallas_call(
        kernel,
        out_shape=jax.ShapeDtypeStruct((n_pad, dn), jnp.float32),
        grid_spec=grid_spec,
        compiler_params=pltpu.CompilerParams(
            # edge tiles all reduce into one shared accumulator -> sequential
            dimension_semantics=("arbitrary",),
            vmem_limit_bytes=32 * 1024 * 1024),
    )(src, dst, x_m, e_m, inv_deg, *msg_flat)


def run_node_kernel(x_m, dh_m, node_flat, ns, nv, node_tile):
    n_pad, dn = x_m.shape
    n_tiles = n_pad // node_tile

    def const_spec(shape):
        return pl.BlockSpec(shape, lambda i: (0,) * len(shape))

    tile_spec = pl.BlockSpec((node_tile, dn), lambda i: (i, 0))
    in_specs = [tile_spec, tile_spec] + [const_spec(w.shape) for w in node_flat]

    grid_spec = pltpu.PrefetchScalarGridSpec(
        num_scalar_prefetch=0,
        grid=(n_tiles,),
        in_specs=in_specs,
        out_specs=pl.BlockSpec((node_tile, dn), lambda i: (i, 0)))

    kernel = make_node_kernel(ns, nv)
    return pl.pallas_call(
        kernel,
        out_shape=jax.ShapeDtypeStruct((n_pad, dn), jnp.float32),
        grid_spec=grid_spec,
        compiler_params=pltpu.CompilerParams(
            dimension_semantics=("parallel",),   # node tiles are independent
            vmem_limit_bytes=32 * 1024 * 1024),
    )(x_m, dh_m, *node_flat)


# ---------------------------------------------------------------------------
# Parameter splitting / flattening for the kernels (exact, no numerics change)
# ---------------------------------------------------------------------------
def _split_gvp_basic(p, si):
    return dict(wh=[p['wh']], wv=p['wv'],
                ws_s=[p['wsw'][:si]], ws_v=p['wsw'][si:], b=p['wsb'])


def _flat_gvp(kp):
    return list(kp['wh']) + [kp['wv']] + list(kp['ws_s']) + [kp['ws_v'], kp['b']]


def prepare_kernel_params(params, node_dims, edge_dims):
    ns, nv = node_dims
    es, ev = edge_dims
    m1 = params['msg'][0]
    # first message GVP: split weights by input segment (src / edge / dst) so
    # the kernel never materializes the concatenated message tensor.
    m1k = dict(
        wh=[m1['wh'][0:nv], m1['wh'][nv:nv + ev], m1['wh'][nv + ev:]],
        wv=m1['wv'],
        ws_s=[m1['wsw'][0:ns], m1['wsw'][ns:ns + es],
              m1['wsw'][ns + es:2 * ns + es]],
        ws_v=m1['wsw'][2 * ns + es:],
        b=m1['wsb'])
    m2k = _split_gvp_basic(params['msg'][1], ns)
    m3k = _split_gvp_basic(params['msg'][2], ns)
    f1k = _split_gvp_basic(params['ff'][0], ns)
    f2k = _split_gvp_basic(params['ff'][1], 4 * ns)
    msg_flat = _flat_gvp(m1k) + _flat_gvp(m2k) + _flat_gvp(m3k)
    node_flat = ([params['ln0_w'], params['ln0_b']]
                 + _flat_gvp(f1k) + _flat_gvp(f2k)
                 + [params['ln1_w'], params['ln1_b']])
    return msg_flat, node_flat


# ---------------------------------------------------------------------------
# Full GVPConvLayer forward (layout glue around the two kernels)
# ---------------------------------------------------------------------------
def gvp_conv_layer(params, x_s, x_v, edge_index, edge_s, edge_v,
                   *, edge_tile=256, node_tile=256):
    N, ns = x_s.shape
    nv = x_v.shape[1]
    E = edge_index.shape[1]
    es = edge_s.shape[1]
    ev = edge_v.shape[1]

    # tile sizes: multiples of 8, clamped to the problem size
    te = _round_up(E, 8) if E <= edge_tile else edge_tile
    tn = _round_up(N, 8) if N <= node_tile else node_tile
    assert te % 8 == 0 and tn % 8 == 0
    e_pad = _round_up(E, te)
    n_pad = _round_up(N, tn)

    # merged, component-major (lane-packed) row layout: [s | vx | vy | vz]
    x_m = jnp.concatenate(
        [x_s, jnp.transpose(x_v, (0, 2, 1)).reshape(N, 3 * nv)], axis=-1)
    e_m = jnp.concatenate(
        [edge_s, jnp.transpose(edge_v, (0, 2, 1)).reshape(E, 3 * ev)], axis=-1)
    x_m = jnp.pad(x_m, ((0, n_pad - N), (0, 0)))
    e_m = jnp.pad(e_m, ((0, e_pad - E), (0, 0)))

    src = jnp.pad(edge_index[0].astype(jnp.int32), (0, e_pad - E))
    dst = jnp.pad(edge_index[1].astype(jnp.int32), (0, e_pad - E))

    # scatter-mean normalization (applied in-kernel at the final write)
    deg = jnp.zeros((N,), jnp.float32).at[edge_index[1]].add(1.0)
    inv = jnp.where(deg > 0, 1.0 / jnp.maximum(deg, 1.0), 0.0)
    inv_deg = jnp.pad(inv, (0, n_pad - N)).reshape(n_pad, 1)

    msg_flat, node_flat = prepare_kernel_params(params, (ns, nv), (es, ev))

    dh_m = run_message_kernel(src, dst, x_m, e_m, inv_deg, msg_flat,
                              ns, nv, es, ev, te, E)
    out_m = run_node_kernel(x_m, dh_m, node_flat, ns, nv, tn)

    out_m = out_m[:N]
    out_s = out_m[:, :ns]
    out_v = jnp.transpose(out_m[:, ns:].reshape(N, 3, nv), (0, 2, 1))
    return out_s, out_v


# ---------------------------------------------------------------------------
# Deterministic parameter initialization (mirrors module __init__ shapes)
# ---------------------------------------------------------------------------
def init_linear(key, din, dout, bias):
    kw, kb = jax.random.split(key)
    bound = 1.0 / math.sqrt(din)
    w = jax.random.uniform(kw, (din, dout), jnp.float32, -bound, bound)
    b = jax.random.uniform(kb, (1, dout), jnp.float32, -bound, bound) if bias else None
    return w, b


def init_gvp(key, in_dims, out_dims):
    si, vi = in_dims
    so, vo = out_dims
    h = max(vi, vo)
    k1, k2, k3 = jax.random.split(key, 3)
    wh, _ = init_linear(k1, vi, h, False)          # Linear(vi, h, bias=False)
    wsw, wsb = init_linear(k2, si + h, so, True)   # Linear(h+si, so), input = [s, vn]
    wv, _ = init_linear(k3, h, vo, False)          # Linear(h, vo, bias=False)
    return dict(wh=wh, wv=wv, wsw=wsw, wsb=wsb)


def init_params(key, node_dims, edge_dims):
    ns, nv = node_dims
    es, ev = edge_dims
    ks = jax.random.split(key, 5)
    msg = [init_gvp(ks[0], (2 * ns + es, 2 * nv + ev), (ns, nv)),
           init_gvp(ks[1], (ns, nv), (ns, nv)),
           init_gvp(ks[2], (ns, nv), (ns, nv))]
    hid = (4 * ns, 2 * nv)
    ff = [init_gvp(ks[3], (ns, nv), hid),
          init_gvp(ks[4], hid, (ns, nv))]
    return dict(msg=msg, ff=ff,
                ln0_w=jnp.ones((1, ns), jnp.float32), ln0_b=jnp.zeros((1, ns), jnp.float32),
                ln1_w=jnp.ones((1, ns), jnp.float32), ln1_b=jnp.zeros((1, ns), jnp.float32))


# ---------------------------------------------------------------------------
# Pure-JAX reference (mirrors the torch code, (rows, n_vec, 3) convention)
# ---------------------------------------------------------------------------
def _gvp_ref(p, s, v, use_acts):
    vt = jnp.swapaxes(v, -1, -2)                                   # (M, 3, vi)
    vh = jnp.einsum('mcv,vh->mch', vt, p['wh'])
    vn = jnp.sqrt(jnp.maximum(jnp.sum(vh ** 2, axis=-2), EPS))
    s_out = jnp.concatenate([s, vn], -1) @ p['wsw'] + p['wsb'][0]
    v_out = jnp.swapaxes(jnp.einsum('mch,ho->mco', vh, p['wv']), -1, -2)
    if use_acts:
        norm = jnp.sqrt(jnp.maximum(jnp.sum(v_out ** 2, -1, keepdims=True), EPS))
        v_out = v_out * jax.nn.sigmoid(norm)
        s_out = jax.nn.relu(s_out)
    return s_out, v_out


def _ln_ref(s, v, w, b):
    mu = jnp.mean(s, -1, keepdims=True)
    var = jnp.mean((s - mu) ** 2, -1, keepdims=True)
    s_out = (s - mu) / jnp.sqrt(var + LN_EPS) * w[0] + b[0]
    vn = jnp.maximum(jnp.sum(v ** 2, -1, keepdims=True), EPS)
    vn = jnp.sqrt(jnp.mean(vn, axis=-2, keepdims=True))
    return s_out, v / vn


def reference(params, x_s, x_v, edge_index, edge_s, edge_v):
    src, dst = edge_index[0], edge_index[1]
    N = x_s.shape[0]
    ms = jnp.concatenate([x_s[src], edge_s, x_s[dst]], -1)
    mv = jnp.concatenate([x_v[src], edge_v, x_v[dst]], -2)
    for i, p in enumerate(params['msg']):
        ms, mv = _gvp_ref(p, ms, mv, use_acts=(i < 2))
    deg = jnp.zeros((N,), jnp.float32).at[dst].add(1.0)
    inv = jnp.where(deg > 0, 1.0 / jnp.maximum(deg, 1.0), 0.0)
    dh_s = jnp.zeros((N, ms.shape[-1]), jnp.float32).at[dst].add(ms) * inv[:, None]
    dh_v = jnp.zeros((N,) + mv.shape[1:], jnp.float32).at[dst].add(mv) * inv[:, None, None]
    s, v = _ln_ref(x_s + dh_s, x_v + dh_v, params['ln0_w'], params['ln0_b'])
    fs, fv = s, v
    for i, p in enumerate(params['ff']):
        fs, fv = _gvp_ref(p, fs, fv, use_acts=(i < len(params['ff']) - 1))
    s, v = _ln_ref(s + fs, v + fv, params['ln1_w'], params['ln1_b'])
    return s, v


# ---------------------------------------------------------------------------
if __name__ == "__main__":
    N, E = 12, 40
    node_dims = (16, 4)   # (n_scalar, n_vector)
    edge_dims = (8, 2)
    ns, nv = node_dims
    es, ev = edge_dims

    key = jax.random.PRNGKey(0)
    k_xs, k_xv, k_es, k_ev, k_src, k_dst, k_par = jax.random.split(key, 7)

    x_s = jax.random.normal(k_xs, (N, ns), jnp.float32)
    x_v = jax.random.normal(k_xv, (N, nv, 3), jnp.float32)
    edge_s = jax.random.normal(k_es, (E, es), jnp.float32)
    edge_v = jax.random.normal(k_ev, (E, ev, 3), jnp.float32)
    src = jax.random.randint(k_src, (E,), 0, N)
    dst = jax.random.randint(k_dst, (E,), 0, N)
    edge_index = jnp.stack([src, dst], axis=0)

    params = init_params(k_par, node_dims, edge_dims)

    # small tiles so both grids have multiple steps (exercises padding + pipeline)
    out_s, out_v = gvp_conv_layer(params, x_s, x_v, edge_index, edge_s, edge_v,
                                  edge_tile=16, node_tile=8)
    out_s = jax.block_until_ready(out_s)
    out_v = jax.block_until_ready(out_v)

    ref_s, ref_v = reference(params, x_s, x_v, edge_index, edge_s, edge_v)

    assert out_s.shape == (N, ns) and out_v.shape == (N, nv, 3)
    assert jnp.allclose(out_s, ref_s, rtol=1e-3, atol=1e-3)
    assert jnp.allclose(out_v, ref_v, rtol=1e-3, atol=1e-3)

    print("KERNEL_OK")
</pallas_src>

<mosaic_0001>
module attributes {stable_mosaic.version = 11 : i64} {
  func.func @kernel(%arg0: i32, %arg1: memref<48xi32, #tpu.memory_space<smem>>, %arg2: memref<48xi32, #tpu.memory_space<smem>>, %arg3: memref<16x28xf32, #tpu.memory_space<vmem>>, %arg4: memref<16x14xf32, #tpu.memory_space<vmem>>, %arg5: memref<16x1xf32, #tpu.memory_space<vmem>>, %arg6: memref<4x10xf32, #tpu.memory_space<vmem>>, %arg7: memref<2x10xf32, #tpu.memory_space<vmem>>, %arg8: memref<4x10xf32, #tpu.memory_space<vmem>>, %arg9: memref<10x4xf32, #tpu.memory_space<vmem>>, %arg10: memref<16x16xf32, #tpu.memory_space<vmem>>, %arg11: memref<8x16xf32, #tpu.memory_space<vmem>>, %arg12: memref<16x16xf32, #tpu.memory_space<vmem>>, %arg13: memref<10x16xf32, #tpu.memory_space<vmem>>, %arg14: memref<1x16xf32, #tpu.memory_space<vmem>>, %arg15: memref<4x4xf32, #tpu.memory_space<vmem>>, %arg16: memref<4x4xf32, #tpu.memory_space<vmem>>, %arg17: memref<16x16xf32, #tpu.memory_space<vmem>>, %arg18: memref<4x16xf32, #tpu.memory_space<vmem>>, %arg19: memref<1x16xf32, #tpu.memory_space<vmem>>, %arg20: memref<4x4xf32, #tpu.memory_space<vmem>>, %arg21: memref<4x4xf32, #tpu.memory_space<vmem>>, %arg22: memref<16x16xf32, #tpu.memory_space<vmem>>, %arg23: memref<4x16xf32, #tpu.memory_space<vmem>>, %arg24: memref<1x16xf32, #tpu.memory_space<vmem>>, %arg25: memref<16x28xf32, #tpu.memory_space<vmem>>, %arg26: memref<16x28xf32, #tpu.memory_space<vmem>>, %arg27: memref<16x28xf32, #tpu.memory_space<vmem>>, %arg28: memref<16x28xf32, #tpu.memory_space<vmem>>, %arg29: memref<16x28xf32, #tpu.memory_space<vmem>>) attributes {dimension_semantics = [#tpu.dimension_semantics<arbitrary>], iteration_bounds = array<i64: 3>, scalar_prefetch = 2 : i64, scratch_operands = 4 : i64, tpu.core_type = #tpu.core_type<tc>, window_params = [{pipeline_mode = #tpu.pipeline_mode<synchronous>, transform_indices = @transform_0, window_bounds = array<i64: 16, 28>}, {transform_indices = @transform_1, window_bounds = array<i64: 16, 14>}, {pipeline_mode = #tpu.pipeline_mode<synchronous>, transform_indices = @transform_2, window_bounds = array<i64: 16, 1>}, {pipeline_mode = #tpu.pipeline_mode<synchronous>, transform_indices = @transform_3, window_bounds = array<i64: 4, 10>}, {pipeline_mode = #tpu.pipeline_mode<synchronous>, transform_indices = @transform_4, window_bounds = array<i64: 2, 10>}, {pipeline_mode = #tpu.pipeline_mode<synchronous>, transform_indices = @transform_5, window_bounds = array<i64: 4, 10>}, {pipeline_mode = #tpu.pipeline_mode<synchronous>, transform_indices = @transform_6, window_bounds = array<i64: 10, 4>}, {pipeline_mode = #tpu.pipeline_mode<synchronous>, transform_indices = @transform_7, window_bounds = array<i64: 16, 16>}, {pipeline_mode = #tpu.pipeline_mode<synchronous>, transform_indices = @transform_8, window_bounds = array<i64: 8, 16>}, {pipeline_mode = #tpu.pipeline_mode<synchronous>, transform_indices = @transform_9, window_bounds = array<i64: 16, 16>}, {pipeline_mode = #tpu.pipeline_mode<synchronous>, transform_indices = @transform_10, window_bounds = array<i64: 10, 16>}, {pipeline_mode = #tpu.pipeline_mode<synchronous>, transform_indices = @transform_11, window_bounds = array<i64: 1, 16>}, {pipeline_mode = #tpu.pipeline_mode<synchronous>, transform_indices = @transform_12, window_bounds = array<i64: 4, 4>}, {pipeline_mode = #tpu.pipeline_mode<synchronous>, transform_indices = @transform_13, window_bounds = array<i64: 4, 4>}, {pipeline_mode = #tpu.pipeline_mode<synchronous>, transform_indices = @transform_14, window_bounds = array<i64: 16, 16>}, {pipeline_mode = #tpu.pipeline_mode<synchronous>, transform_indices = @transform_15, window_bounds = array<i64: 4, 16>}, {pipeline_mode = #tpu.pipeline_mode<synchronous>, transform_indices = @transform_16, window_bounds = array<i64: 1, 16>}, {pipeline_mode = #tpu.pipeline_mode<synchronous>, transform_indices = @transform_17, window_bounds = array<i64: 4, 4>}, {pipeline_mode = #tpu.pipeline_mode<synchronous>, transform_indices = @transform_18, window_bounds = array<i64: 4, 4>}, {pipeline_mode = #tpu.pipeline_mode<synchronous>, transform_indices = @transform_19, window_bounds = array<i64: 16, 16>}, {pipeline_mode = #tpu.pipeline_mode<synchronous>, transform_indices = @transform_20, window_bounds = array<i64: 4, 16>}, {pipeline_mode = #tpu.pipeline_mode<synchronous>, transform_indices = @transform_21, window_bounds = array<i64: 1, 16>}, {pipeline_mode = #tpu.pipeline_mode<synchronous>, transform_indices = @transform_22, window_bounds = array<i64: 16, 28>}]} {
    %c0_i32 = arith.constant 0 : i32
    %0 = arith.cmpi eq, %arg0, %c0_i32 : i32
    %1 = arith.extui %0 : i1 to i32
    %c0_i32_0 = arith.constant 0 : i32
    %2 = arith.cmpi ne, %1, %c0_i32_0 : i32
    scf.if %2 {
      %cst_93 = arith.constant 0.000000e+00 : f32
      %153 = vector.broadcast %cst_93 : f32 to vector<16x28xf32>
      %c0_94 = arith.constant 0 : index
      %c0_95 = arith.constant 0 : index
      %154 = vector.load %arg26[%c0_94, %c0_95] : memref<16x28xf32, #tpu.memory_space<vmem>>, vector<16x28xf32>
      tpu.vector_store %arg26[%c0_94, %c0_95], %153 {strides = array<i32>} : memref<16x28xf32, #tpu.memory_space<vmem>>, vector<16x28xf32>,
    } else {
    }
    %c0_i32_1 = arith.constant 0 : i32
    %c16_i32 = arith.constant 16 : i32
    %3 = arith.addi %c0_i32_1, %c16_i32 : i32
    %c1_i32 = arith.constant 1 : i32
    scf.for %arg30 = %c0_i32_1 to %3 step %c1_i32  : i32 {
      %c16_i32_93 = arith.constant 16 : i32
      %153 = arith.muli %arg0, %c16_i32_93 : i32
      %154 = arith.addi %153, %arg30 : i32
      %155 = arith.index_cast %154 : i32 to index
      %156 = memref.load %arg1[%155] : memref<48xi32, #tpu.memory_space<smem>>
      %157 = arith.index_cast %154 : i32 to index
      %158 = memref.load %arg2[%157] : memref<48xi32, #tpu.memory_space<smem>>
      %159 = arith.index_cast %156 : i32 to index
      %c0_94 = arith.constant 0 : index
      %160 = vector.load %arg3[%159, %c0_94] : memref<16x28xf32, #tpu.memory_space<vmem>>, vector<1x28xf32>
      %161 = arith.index_cast %arg30 : i32 to index
      %c0_95 = arith.constant 0 : index
      %162 = vector.load %arg27[%161, %c0_95] : memref<16x28xf32, #tpu.memory_space<vmem>>, vector<1x28xf32>
      tpu.vector_store %arg27[%161, %c0_95], %160 {strides = array<i32>} : memref<16x28xf32, #tpu.memory_space<vmem>>, vector<1x28xf32>,
      %163 = arith.index_cast %158 : i32 to index
      %c0_96 = arith.constant 0 : index
      %164 = vector.load %arg3[%163, %c0_96] : memref<16x28xf32, #tpu.memory_space<vmem>>, vector<1x28xf32>
      %165 = arith.index_cast %arg30 : i32 to index
      %c0_97 = arith.constant 0 : index
      %166 = vector.load %arg28[%165, %c0_97] : memref<16x28xf32, #tpu.memory_space<vmem>>, vector<1x28xf32>
      tpu.vector_store %arg28[%165, %c0_97], %164 {strides = array<i32>} : memref<16x28xf32, #tpu.memory_space<vmem>>, vector<1x28xf32>,
    }
    %c16_i32_2 = arith.constant 16 : i32
    %c0 = arith.constant 0 : index
    %c0_3 = arith.constant 0 : index
    %4 = vector.load %arg6[%c0, %c0_3] : memref<4x10xf32, #tpu.memory_space<vmem>>, vector<4x10xf32>
    %c0_4 = arith.constant 0 : index
    %c0_5 = arith.constant 0 : index
    %5 = vector.load %arg7[%c0_4, %c0_5] : memref<2x10xf32, #tpu.memory_space<vmem>>, vector<2x10xf32>
    %c0_6 = arith.constant 0 : index
    %c0_7 = arith.constant 0 : index
    %6 = vector.load %arg8[%c0_6, %c0_7] : memref<4x10xf32, #tpu.memory_space<vmem>>, vector<4x10xf32>
    %c0_8 = arith.constant 0 : index
    %c0_9 = arith.constant 0 : index
    %7 = vector.load %arg9[%c0_8, %c0_9] : memref<10x4xf32, #tpu.memory_space<vmem>>, vector<10x4xf32>
    %c0_10 = arith.constant 0 : index
    %c0_11 = arith.constant 0 : index
    %8 = vector.load %arg10[%c0_10, %c0_11] : memref<16x16xf32, #tpu.memory_space<vmem>>, vector<16x16xf32>
    %c0_12 = arith.constant 0 : index
    %c0_13 = arith.constant 0 : index
    %9 = vector.load %arg11[%c0_12, %c0_13] : memref<8x16xf32, #tpu.memory_space<vmem>>, vector<8x16xf32>
    %c0_14 = arith.constant 0 : index
    %c0_15 = arith.constant 0 : index
    %10 = vector.load %arg12[%c0_14, %c0_15] : memref<16x16xf32, #tpu.memory_space<vmem>>, vector<16x16xf32>
    %c0_16 = arith.constant 0 : index
    %c0_17 = arith.constant 0 : index
    %11 = vector.load %arg13[%c0_16, %c0_17] : memref<10x16xf32, #tpu.memory_space<vmem>>, vector<10x16xf32>
    %c0_18 = arith.constant 0 : index
    %c0_19 = arith.constant 0 : index
    %12 = vector.load %arg14[%c0_18, %c0_19] : memref<1x16xf32, #tpu.memory_space<vmem>>, vector<1x16xf32>
    %c0_20 = arith.constant 0 : index
    %c0_21 = arith.constant 0 : index
    %13 = vector.load %arg15[%c0_20, %c0_21] : memref<4x4xf32, #tpu.memory_space<vmem>>, vector<4x4xf32>
    %c0_22 = arith.constant 0 : index
    %c0_23 = arith.constant 0 : index
    %14 = vector.load %arg16[%c0_22, %c0_23] : memref<4x4xf32, #tpu.memory_space<vmem>>, vector<4x4xf32>
    %c0_24 = arith.constant 0 : index
    %c0_25 = arith.constant 0 : index
    %15 = vector.load %arg17[%c0_24, %c0_25] : memref<16x16xf32, #tpu.memory_space<vmem>>, vector<16x16xf32>
    %c0_26 = arith.constant 0 : index
    %c0_27 = arith.constant 0 : index
    %16 = vector.load %arg18[%c0_26, %c0_27] : memref<4x16xf32, #tpu.memory_space<vmem>>, vector<4x16xf32>
    %c0_28 = arith.constant 0 : index
    %c0_29 = arith.constant 0 : index
    %17 = vector.load %arg19[%c0_28, %c0_29] : memref<1x16xf32, #tpu.memory_space<vmem>>, vector<1x16xf32>
    %c0_30 = arith.constant 0 : index
    %c0_31 = arith.constant 0 : index
    %18 = vector.load %arg20[%c0_30, %c0_31] : memref<4x4xf32, #tpu.memory_space<vmem>>, vector<4x4xf32>
    %c0_32 = arith.constant 0 : index
    %c0_33 = arith.constant 0 : index
    %19 = vector.load %arg21[%c0_32, %c0_33] : memref<4x4xf32, #tpu.memory_space<vmem>>, vector<4x4xf32>
    %c0_34 = arith.constant 0 : index
    %c0_35 = arith.constant 0 : index
    %20 = vector.load %arg22[%c0_34, %c0_35] : memref<16x16xf32, #tpu.memory_space<vmem>>, vector<16x16xf32>
    %c0_36 = arith.constant 0 : index
    %c0_37 = arith.constant 0 : index
    %21 = vector.load %arg23[%c0_36, %c0_37] : memref<4x16xf32, #tpu.memory_space<vmem>>, vector<4x16xf32>
    %c0_38 = arith.constant 0 : index
    %c0_39 = arith.constant 0 : index
    %22 = vector.load %arg24[%c0_38, %c0_39] : memref<1x16xf32, #tpu.memory_space<vmem>>, vector<1x16xf32>
    %c0_40 = arith.constant 0 : index
    %c0_41 = arith.constant 0 : index
    %23 = vector.load %arg27[%c0_40, %c0_41] : memref<16x28xf32, #tpu.memory_space<vmem>>, vector<16x28xf32>
    %c0_42 = arith.constant 0 : index
    %c0_43 = arith.constant 0 : index
    %24 = vector.load %arg28[%c0_42, %c0_43] : memref<16x28xf32, #tpu.memory_space<vmem>>, vector<16x28xf32>
    %c0_44 = arith.constant 0 : index
    %c0_45 = arith.constant 0 : index
    %25 = vector.load %arg4[%c0_44, %c0_45] : memref<16x14xf32, #tpu.memory_space<vmem>>, vector<16x14xf32>
    %26 = vector.extract_strided_slice %23 {offsets = [0, 0], sizes = [16, 16], strides = [1, 1]} : vector<16x28xf32> to vector<16x16xf32>
    %27 = vector.extract_strided_slice %25 {offsets = [0, 0], sizes = [16, 8], strides = [1, 1]} : vector<16x14xf32> to vector<16x8xf32>
    %28 = vector.extract_strided_slice %24 {offsets = [0, 0], sizes = [16, 16], strides = [1, 1]} : vector<16x28xf32> to vector<16x16xf32>
    %29 = vector.extract_strided_slice %23 {offsets = [0, 16], sizes = [16, 4], strides = [1, 1]} : vector<16x28xf32> to vector<16x4xf32>
    %30 = vector.extract_strided_slice %25 {offsets = [0, 8], sizes = [16, 2], strides = [1, 1]} : vector<16x14xf32> to vector<16x2xf32>
    %31 = vector.extract_strided_slice %24 {offsets = [0, 16], sizes = [16, 4], strides = [1, 1]} : vector<16x28xf32> to vector<16x4xf32>
    %32 = vector.extract_strided_slice %23 {offsets = [0, 20], sizes = [16, 4], strides = [1, 1]} : vector<16x28xf32> to vector<16x4xf32>
    %33 = vector.extract_strided_slice %25 {offsets = [0, 10], sizes = [16, 2], strides = [1, 1]} : vector<16x14xf32> to vector<16x2xf32>
    %34 = vector.extract_strided_slice %24 {offsets = [0, 20], sizes = [16, 4], strides = [1, 1]} : vector<16x28xf32> to vector<16x4xf32>
    %35 = vector.extract_strided_slice %23 {offsets = [0, 24], sizes = [16, 4], strides = [1, 1]} : vector<16x28xf32> to vector<16x4xf32>
    %36 = vector.extract_strided_slice %25 {offsets = [0, 12], sizes = [16, 2], strides = [1, 1]} : vector<16x14xf32> to vector<16x2xf32>
    %37 = vector.extract_strided_slice %24 {offsets = [0, 24], sizes = [16, 4], strides = [1, 1]} : vector<16x28xf32> to vector<16x4xf32>
    %cst = arith.constant dense<0.000000e+00> : vector<16x10xf32>
    %38 = tpu.matmul %29, %4, %cst {dimension_numbers = #tpu.dot_dimension_numbers<[1], [0], [0], [1], [0, 0, 1, 1], [], []>} : vector<16x4xf32>, vector<4x10xf32>, vector<16x10xf32> -> vector<16x10xf32>
    %cst_46 = arith.constant dense<0.000000e+00> : vector<16x10xf32>
    %39 = tpu.matmul %30, %5, %cst_46 {dimension_numbers = #tpu.dot_dimension_numbers<[1], [0], [0], [1], [0, 0, 1, 1], [], []>} : vector<16x2xf32>, vector<2x10xf32>, vector<16x10xf32> -> vector<16x10xf32>
    %40 = arith.addf %38, %39 : vector<16x10xf32>
    %cst_47 = arith.constant dense<0.000000e+00> : vector<16x10xf32>
    %41 = tpu.matmul %31, %6, %cst_47 {dimension_numbers = #tpu.dot_dimension_numbers<[1], [0], [0], [1], [0, 0, 1, 1], [], []>} : vector<16x4xf32>, vector<4x10xf32>, vector<16x10xf32> -> vector<16x10xf32>
    %42 = arith.addf %40, %41 : vector<16x10xf32>
    %cst_48 = arith.constant dense<0.000000e+00> : vector<16x10xf32>
    %43 = tpu.matmul %32, %4, %cst_48 {dimension_numbers = #tpu.dot_dimension_numbers<[1], [0], [0], [1], [0, 0, 1, 1], [], []>} : vector<16x4xf32>, vector<4x10xf32>, vector<16x10xf32> -> vector<16x10xf32>
    %cst_49 = arith.constant dense<0.000000e+00> : vector<16x10xf32>
    %44 = tpu.matmul %33, %5, %cst_49 {dimension_numbers = #tpu.dot_dimension_numbers<[1], [0], [0], [1], [0, 0, 1, 1], [], []>} : vector<16x2xf32>, vector<2x10xf32>, vector<16x10xf32> -> vector<16x10xf32>
    %45 = arith.addf %43, %44 : vector<16x10xf32>
    %cst_50 = arith.constant dense<0.000000e+00> : vector<16x10xf32>
    %46 = tpu.matmul %34, %6, %cst_50 {dimension_numbers = #tpu.dot_dimension_numbers<[1], [0], [0], [1], [0, 0, 1, 1], [], []>} : vector<16x4xf32>, vector<4x10xf32>, vector<16x10xf32> -> vector<16x10xf32>
    %47 = arith.addf %45, %46 : vector<16x10xf32>
    %cst_51 = arith.constant dense<0.000000e+00> : vector<16x10xf32>
    %48 = tpu.matmul %35, %4, %cst_51 {dimension_numbers = #tpu.dot_dimension_numbers<[1], [0], [0], [1], [0, 0, 1, 1], [], []>} : vector<16x4xf32>, vector<4x10xf32>, vector<16x10xf32> -> vector<16x10xf32>
    %cst_52 = arith.constant dense<0.000000e+00> : vector<16x10xf32>
    %49 = tpu.matmul %36, %5, %cst_52 {dimension_numbers = #tpu.dot_dimension_numbers<[1], [0], [0], [1], [0, 0, 1, 1], [], []>} : vector<16x2xf32>, vector<2x10xf32>, vector<16x10xf32> -> vector<16x10xf32>
    %50 = arith.addf %48, %49 : vector<16x10xf32>
    %cst_53 = arith.constant dense<0.000000e+00> : vector<16x10xf32>
    %51 = tpu.matmul %37, %6, %cst_53 {dimension_numbers = #tpu.dot_dimension_numbers<[1], [0], [0], [1], [0, 0, 1, 1], [], []>} : vector<16x4xf32>, vector<4x10xf32>, vector<16x10xf32> -> vector<16x10xf32>
    %52 = arith.addf %50, %51 : vector<16x10xf32>
    %53 = arith.mulf %42, %42 : vector<16x10xf32>
    %54 = arith.mulf %47, %47 : vector<16x10xf32>
    %55 = arith.addf %53, %54 : vector<16x10xf32>
    %56 = arith.mulf %52, %52 : vector<16x10xf32>
    %57 = arith.addf %55, %56 : vector<16x10xf32>
    %cst_54 = arith.constant 9.99999993E-9 : f32
    %58 = vector.broadcast %cst_54 : f32 to vector<16x10xf32>
    %59 = arith.maximumf %57, %58 : vector<16x10xf32>
    %60 = math.sqrt %59 : vector<16x10xf32>
    %cst_55 = arith.constant dense<0.000000e+00> : vector<16x16xf32>
    %61 = tpu.matmul %26, %8, %cst_55 {dimension_numbers = #tpu.dot_dimension_numbers<[1], [0], [0], [1], [0, 0, 1, 1], [], []>} : vector<16x16xf32>, vector<16x16xf32>, vector<16x16xf32> -> vector<16x16xf32>
    %62 = vector.broadcast %12 : vector<1x16xf32> to vector<16x16xf32>
    %63 = arith.addf %62, %61 : vector<16x16xf32>
    %cst_56 = arith.constant dense<0.000000e+00> : vector<16x16xf32>
    %64 = tpu.matmul %27, %9, %cst_56 {dimension_numbers = #tpu.dot_dimension_numbers<[1], [0], [0], [1], [0, 0, 1, 1], [], []>} : vector<16x8xf32>, vector<8x16xf32>, vector<16x16xf32> -> vector<16x16xf32>
    %65 = arith.addf %63, %64 : vector<16x16xf32>
    %cst_57 = arith.constant dense<0.000000e+00> : vector<16x16xf32>
    %66 = tpu.matmul %28, %10, %cst_57 {dimension_numbers = #tpu.dot_dimension_numbers<[1], [0], [0], [1], [0, 0, 1, 1], [], []>} : vector<16x16xf32>, vector<16x16xf32>, vector<16x16xf32> -> vector<16x16xf32>
    %67 = arith.addf %65, %66 : vector<16x16xf32>
    %cst_58 = arith.constant dense<0.000000e+00> : vector<16x16xf32>
    %68 = tpu.matmul %60, %11, %cst_58 {dimension_numbers = #tpu.dot_dimension_numbers<[1], [0], [0], [1], [0, 0, 1, 1], [], []>} : vector<16x10xf32>, vector<10x16xf32>, vector<16x16xf32> -> vector<16x16xf32>
    %69 = arith.addf %67, %68 : vector<16x16xf32>
    %cst_59 = arith.constant dense<0.000000e+00> : vector<16x4xf32>
    %70 = tpu.matmul %42, %7, %cst_59 {dimension_numbers = #tpu.dot_dimension_numbers<[1], [0], [0], [1], [0, 0, 1, 1], [], []>} : vector<16x10xf32>, vector<10x4xf32>, vector<16x4xf32> -> vector<16x4xf32>
    %cst_60 = arith.constant dense<0.000000e+00> : vector<16x4xf32>
    %71 = tpu.matmul %47, %7, %cst_60 {dimension_numbers = #tpu.dot_dimension_numbers<[1], [0], [0], [1], [0, 0, 1, 1], [], []>} : vector<16x10xf32>, vector<10x4xf32>, vector<16x4xf32> -> vector<16x4xf32>
    %cst_61 = arith.constant dense<0.000000e+00> : vector<16x4xf32>
    %72 = tpu.matmul %52, %7, %cst_61 {dimension_numbers = #tpu.dot_dimension_numbers<[1], [0], [0], [1], [0, 0, 1, 1], [], []>} : vector<16x10xf32>, vector<10x4xf32>, vector<16x4xf32> -> vector<16x4xf32>
    %73 = arith.mulf %70, %70 : vector<16x4xf32>
    %74 = arith.mulf %71, %71 : vector<16x4xf32>
    %75 = arith.addf %73, %74 : vector<16x4xf32>
    %76 = arith.mulf %72, %72 : vector<16x4xf32>
    %77 = arith.addf %75, %76 : vector<16x4xf32>
    %cst_62 = arith.constant 9.99999993E-9 : f32
    %78 = vector.broadcast %cst_62 : f32 to vector<16x4xf32>
    %79 = arith.maximumf %77, %78 : vector<16x4xf32>
    %80 = math.sqrt %79 : vector<16x4xf32>
    %81 = arith.negf %80 : vector<16x4xf32>
    %82 = math.exp %81 : vector<16x4xf32>
    %cst_63 = arith.constant 1.000000e+00 : f32
    %83 = vector.broadcast %cst_63 : f32 to vector<16x4xf32>
    %84 = arith.addf %83, %82 : vector<16x4xf32>
    %85 = arith.divf %83, %84 : vector<16x4xf32>
    %86 = arith.mulf %70, %85 : vector<16x4xf32>
    %87 = arith.mulf %71, %85 : vector<16x4xf32>
    %88 = arith.mulf %72, %85 : vector<16x4xf32>
    %cst_64 = arith.constant 0.000000e+00 : f32
    %89 = vector.broadcast %cst_64 : f32 to vector<16x16xf32>
    %90 = arith.maximumf %69, %89 : vector<16x16xf32>
    %cst_65 = arith.constant dense<0.000000e+00> : vector<16x4xf32>
    %91 = tpu.matmul %86, %13, %cst_65 {dimension_numbers = #tpu.dot_dimension_numbers<[1], [0], [0], [1], [0, 0, 1, 1], [], []>} : vector<16x4xf32>, vector<4x4xf32>, vector<16x4xf32> -> vector<16x4xf32>
    %cst_66 = arith.constant dense<0.000000e+00> : vector<16x4xf32>
    %92 = tpu.matmul %87, %13, %cst_66 {dimension_numbers = #tpu.dot_dimension_numbers<[1], [0], [0], [1], [0, 0, 1, 1], [], []>} : vector<16x4xf32>, vector<4x4xf32>, vector<16x4xf32> -> vector<16x4xf32>
    %cst_67 = arith.constant dense<0.000000e+00> : vector<16x4xf32>
    %93 = tpu.matmul %88, %13, %cst_67 {dimension_numbers = #tpu.dot_dimension_numbers<[1], [0], [0], [1], [0, 0, 1, 1], [], []>} : vector<16x4xf32>, vector<4x4xf32>, vector<16x4xf32> -> vector<16x4xf32>
    %94 = arith.mulf %91, %91 : vector<16x4xf32>
    %95 = arith.mulf %92, %92 : vector<16x4xf32>
    %96 = arith.addf %94, %95 : vector<16x4xf32>
    %97 = arith.mulf %93, %93 : vector<16x4xf32>
    %98 = arith.addf %96, %97 : vector<16x4xf32>
    %cst_68 = arith.constant 9.99999993E-9 : f32
    %99 = vector.broadcast %cst_68 : f32 to vector<16x4xf32>
    %100 = arith.maximumf %98, %99 : vector<16x4xf32>
    %101 = math.sqrt %100 : vector<16x4xf32>
    %cst_69 = arith.constant dense<0.000000e+00> : vector<16x16xf32>
    %102 = tpu.matmul %90, %15, %cst_69 {dimension_numbers = #tpu.dot_dimension_numbers<[1], [0], [0], [1], [0, 0, 1, 1], [], []>} : vector<16x16xf32>, vector<16x16xf32>, vector<16x16xf32> -> vector<16x16xf32>
    %103 = vector.broadcast %17 : vector<1x16xf32> to vector<16x16xf32>
    %104 = arith.addf %103, %102 : vector<16x16xf32>
    %cst_70 = arith.constant dense<0.000000e+00> : vector<16x16xf32>
    %105 = tpu.matmul %101, %16, %cst_70 {dimension_numbers = #tpu.dot_dimension_numbers<[1], [0], [0], [1], [0, 0, 1, 1], [], []>} : vector<16x4xf32>, vector<4x16xf32>, vector<16x16xf32> -> vector<16x16xf32>
    %106 = arith.addf %104, %105 : vector<16x16xf32>
    %cst_71 = arith.constant dense<0.000000e+00> : vector<16x4xf32>
    %107 = tpu.matmul %91, %14, %cst_71 {dimension_numbers = #tpu.dot_dimension_numbers<[1], [0], [0], [1], [0, 0, 1, 1], [], []>} : vector<16x4xf32>, vector<4x4xf32>, vector<16x4xf32> -> vector<16x4xf32>
    %cst_72 = arith.constant dense<0.000000e+00> : vector<16x4xf32>
    %108 = tpu.matmul %92, %14, %cst_72 {dimension_numbers = #tpu.dot_dimension_numbers<[1], [0], [0], [1], [0, 0, 1, 1], [], []>} : vector<16x4xf32>, vector<4x4xf32>, vector<16x4xf32> -> vector<16x4xf32>
    %cst_73 = arith.constant dense<0.000000e+00> : vector<16x4xf32>
    %109 = tpu.matmul %93, %14, %cst_73 {dimension_numbers = #tpu.dot_dimension_numbers<[1], [0], [0], [1], [0, 0, 1, 1], [], []>} : vector<16x4xf32>, vector<4x4xf32>, vector<16x4xf32> -> vector<16x4xf32>
    %110 = arith.mulf %107, %107 : vector<16x4xf32>
    %111 = arith.mulf %108, %108 : vector<16x4xf32>
    %112 = arith.addf %110, %111 : vector<16x4xf32>
    %113 = arith.mulf %109, %109 : vector<16x4xf32>
    %114 = arith.addf %112, %113 : vector<16x4xf32>
    %cst_74 = arith.constant 9.99999993E-9 : f32
    %115 = vector.broadcast %cst_74 : f32 to vector<16x4xf32>
    %116 = arith.maximumf %114, %115 : vector<16x4xf32>
    %117 = math.sqrt %116 : vector<16x4xf32>
    %118 = arith.negf %117 : vector<16x4xf32>
    %119 = math.exp %118 : vector<16x4xf32>
    %cst_75 = arith.constant 1.000000e+00 : f32
    %120 = vector.broadcast %cst_75 : f32 to vector<16x4xf32>
    %121 = arith.addf %120, %119 : vector<16x4xf32>
    %122 = arith.divf %120, %121 : vector<16x4xf32>
    %123 = arith.mulf %107, %122 : vector<16x4xf32>
    %124 = arith.mulf %108, %122 : vector<16x4xf32>
    %125 = arith.mulf %109, %122 : vector<16x4xf32>
    %cst_76 = arith.constant 0.000000e+00 : f32
    %126 = vector.broadcast %cst_76 : f32 to vector<16x16xf32>
    %127 = arith.maximumf %106, %126 : vector<16x16xf32>
    %cst_77 = arith.constant dense<0.000000e+00> : vector<16x4xf32>
    %128 = tpu.matmul %123, %18, %cst_77 {dimension_numbers = #tpu.dot_dimension_numbers<[1], [0], [0], [1], [0, 0, 1, 1], [], []>} : vector<16x4xf32>, vector<4x4xf32>, vector<16x4xf32> -> vector<16x4xf32>
    %cst_78 = arith.constant dense<0.000000e+00> : vector<16x4xf32>
    %129 = tpu.matmul %124, %18, %cst_78 {dimension_numbers = #tpu.dot_dimension_numbers<[1], [0], [0], [1], [0, 0, 1, 1], [], []>} : vector<16x4xf32>, vector<4x4xf32>, vector<16x4xf32> -> vector<16x4xf32>
    %cst_79 = arith.constant dense<0.000000e+00> : vector<16x4xf32>
    %130 = tpu.matmul %125, %18, %cst_79 {dimension_numbers = #tpu.dot_dimension_numbers<[1], [0], [0], [1], [0, 0, 1, 1], [], []>} : vector<16x4xf32>, vector<4x4xf32>, vector<16x4xf32> -> vector<16x4xf32>
    %131 = arith.mulf %128, %128 : vector<16x4xf32>
    %132 = arith.mulf %129, %129 : vector<16x4xf32>
    %133 = arith.addf %131, %132 : vector<16x4xf32>
    %134 = arith.mulf %130, %130 : vector<16x4xf32>
    %135 = arith.addf %133, %134 : vector<16x4xf32>
    %cst_80 = arith.constant 9.99999993E-9 : f32
    %136 = vector.broadcast %cst_80 : f32 to vector<16x4xf32>
    %137 = arith.maximumf %135, %136 : vector<16x4xf32>
    %138 = math.sqrt %137 : vector<16x4xf32>
    %cst_81 = arith.constant dense<0.000000e+00> : vector<16x16xf32>
    %139 = tpu.matmul %127, %20, %cst_81 {dimension_numbers = #tpu.dot_dimension_numbers<[1], [0], [0], [1], [0, 0, 1, 1], [], []>} : vector<16x16xf32>, vector<16x16xf32>, vector<16x16xf32> -> vector<16x16xf32>
    %140 = vector.broadcast %22 : vector<1x16xf32> to vector<16x16xf32>
    %141 = arith.addf %140, %139 : vector<16x16xf32>
    %cst_82 = arith.constant dense<0.000000e+00> : vector<16x16xf32>
    %142 = tpu.matmul %138, %21, %cst_82 {dimension_numbers = #tpu.dot_dimension_numbers<[1], [0], [0], [1], [0, 0, 1, 1], [], []>} : vector<16x4xf32>, vector<4x16xf32>, vector<16x16xf32> -> vector<16x16xf32>
    %143 = arith.addf %141, %142 : vector<16x16xf32>
    %cst_83 = arith.constant dense<0.000000e+00> : vector<16x4xf32>
    %144 = tpu.matmul %128, %19, %cst_83 {dimension_numbers = #tpu.dot_dimension_numbers<[1], [0], [0], [1], [0, 0, 1, 1], [], []>} : vector<16x4xf32>, vector<4x4xf32>, vector<16x4xf32> -> vector<16x4xf32>
    %cst_84 = arith.constant dense<0.000000e+00> : vector<16x4xf32>
    %145 = tpu.matmul %129, %19, %cst_84 {dimension_numbers = #tpu.dot_dimension_numbers<[1], [0], [0], [1], [0, 0, 1, 1], [], []>} : vector<16x4xf32>, vector<4x4xf32>, vector<16x4xf32> -> vector<16x4xf32>
    %cst_85 = arith.constant dense<0.000000e+00> : vector<16x4xf32>
    %146 = tpu.matmul %130, %19, %cst_85 {dimension_numbers = #tpu.dot_dimension_numbers<[1], [0], [0], [1], [0, 0, 1, 1], [], []>} : vector<16x4xf32>, vector<4x4xf32>, vector<16x4xf32> -> vector<16x4xf32>
    %147 = tpu.concatenate %143, %144, %145, %146 in 1 : vector<16x16xf32>, vector<16x4xf32>, vector<16x4xf32>, vector<16x4xf32> -> vector<16x28xf32>
    %c0_86 = arith.constant 0 : index
    %c0_87 = arith.constant 0 : index
    %148 = vector.load %arg29[%c0_86, %c0_87] : memref<16x28xf32, #tpu.memory_space<vmem>>, vector<16x28xf32>
    tpu.vector_store %arg29[%c0_86, %c0_87], %147 {strides = array<i32>} : memref<16x28xf32, #tpu.memory_space<vmem>>, vector<16x28xf32>,
    %c0_i32_88 = arith.constant 0 : i32
    %c16_i32_89 = arith.constant 16 : i32
    %149 = arith.addi %c0_i32_88, %c16_i32_89 : i32
    %c1_i32_90 = arith.constant 1 : i32
    scf.for %arg30 = %c0_i32_88 to %149 step %c1_i32_90  : i32 {
      %c16_i32_93 = arith.constant 16 : i32
      %153 = arith.muli %arg0, %c16_i32_93 : i32
      %154 = arith.addi %153, %arg30 : i32
      %155 = arith.index_cast %154 : i32 to index
      %156 = memref.load %arg2[%155] : memref<48xi32, #tpu.memory_space<smem>>
      %c40_i32 = arith.constant 40 : i32
      %157 = arith.cmpi slt, %154, %c40_i32 : i32
      %cst_94 = arith.constant 1.000000e+00 : f32
      %cst_95 = arith.constant 0.000000e+00 : f32
      %158 = arith.select %157, %cst_94, %cst_95 : f32
      %159 = arith.index_cast %156 : i32 to index
      %c0_96 = arith.constant 0 : index
      %160 = vector.load %arg26[%159, %c0_96] : memref<16x28xf32, #tpu.memory_space<vmem>>, vector<1x28xf32>
      %161 = arith.index_cast %arg30 : i32 to index
      %c0_97 = arith.constant 0 : index
      %162 = vector.load %arg29[%161, %c0_97] : memref<16x28xf32, #tpu.memory_space<vmem>>, vector<1x28xf32>
      %163 = vector.broadcast %158 : f32 to vector<1x28xf32>
      %164 = arith.mulf %163, %162 : vector<1x28xf32>
      %165 = arith.addf %160, %164 : vector<1x28xf32>
      %166 = arith.index_cast %156 : i32 to index
      %c0_98 = arith.constant 0 : index
      %167 = vector.load %arg26[%166, %c0_98] : memref<16x28xf32, #tpu.memory_space<vmem>>, vector<1x28xf32>
      tpu.vector_store %arg26[%166, %c0_98], %165 {strides = array<i32>} : memref<16x28xf32, #tpu.memory_space<vmem>>, vector<1x28xf32>,
    }
    %c16_i32_91 = arith.constant 16 : i32
    %c2_i32 = arith.constant 2 : i32
    %150 = arith.cmpi eq, %arg0, %c2_i32 : i32
    %151 = arith.extui %150 : i1 to i32
    %c0_i32_92 = arith.constant 0 : i32
    %152 = arith.cmpi ne, %151, %c0_i32_92 : i32
    scf.if %152 {
      %c0_93 = arith.constant 0 : index
      %c0_94 = arith.constant 0 : index
      %153 = vector.load %arg26[%c0_93, %c0_94] : memref<16x28xf32, #tpu.memory_space<vmem>>, vector<16x28xf32>
      %c0_95 = arith.constant 0 : index
      %c0_96 = arith.constant 0 : index
      %154 = vector.load %arg5[%c0_95, %c0_96] : memref<16x1xf32, #tpu.memory_space<vmem>>, vector<16x1xf32>
      %155 = vector.broadcast %154 : vector<16x1xf32> to vector<16x28xf32>
      %156 = arith.mulf %153, %155 : vector<16x28xf32>
      %c0_97 = arith.constant 0 : index
      %c0_98 = arith.constant 0 : index
      %157 = vector.load %arg25[%c0_97, %c0_98] : memref<16x28xf32, #tpu.memory_space<vmem>>, vector<16x28xf32>
      tpu.vector_store %arg25[%c0_97, %c0_98], %156 {strides = array<i32>} : memref<16x28xf32, #tpu.memory_space<vmem>>, vector<16x28xf32>,
    } else {
    }
    return
  }
  func.func @transform_0(%arg0: i32, %arg1: memref<48xi32, #tpu.memory_space<smem>>, %arg2: memref<48xi32, #tpu.memory_space<smem>>) -> (i32, i32) {
    %c0_i32 = arith.constant 0 : i32
    %c0_i32_0 = arith.constant 0 : i32
    %c0_i32_1 = arith.constant 0 : i32
    return %c0_i32, %c0_i32_0 : i32, i32
  }
  func.func @transform_1(%arg0: i32, %arg1: memref<48xi32, #tpu.memory_space<smem>>, %arg2: memref<48xi32, #tpu.memory_space<smem>>) -> (i32, i32) {
    %c0_i32 = arith.constant 0 : i32
    %c0_i32_0 = arith.constant 0 : i32
    return %arg0, %c0_i32 : i32, i32
  }
  func.func @transform_2(%arg0: i32, %arg1: memref<48xi32, #tpu.memory_space<smem>>, %arg2: memref<48xi32, #tpu.memory_space<smem>>) -> (i32, i32) {
    %c0_i32 = arith.constant 0 : i32
    %c0_i32_0 = arith.constant 0 : i32
    %c0_i32_1 = arith.constant 0 : i32
    return %c0_i32, %c0_i32_0 : i32, i32
  }
  func.func @transform_3(%arg0: i32, %arg1: memref<48xi32, #tpu.memory_space<smem>>, %arg2: memref<48xi32, #tpu.memory_space<smem>>) -> (i32, i32) {
    %c0_i32 = arith.constant 0 : i32
    %c0_i32_0 = arith.constant 0 : i32
    %c0_i32_1 = arith.constant 0 : i32
    return %c0_i32, %c0_i32_0 : i32, i32
  }
  func.func @transform_4(%arg0: i32, %arg1: memref<48xi32, #tpu.memory_space<smem>>, %arg2: memref<48xi32, #tpu.memory_space<smem>>) -> (i32, i32) {
    %c0_i32 = arith.constant 0 : i32
    %c0_i32_0 = arith.constant 0 : i32
    %c0_i32_1 = arith.constant 0 : i32
    return %c0_i32, %c0_i32_0 : i32, i32
  }
  func.func @transform_5(%arg0: i32, %arg1: memref<48xi32, #tpu.memory_space<smem>>, %arg2: memref<48xi32, #tpu.memory_space<smem>>) -> (i32, i32) {
    %c0_i32 = arith.constant 0 : i32
    %c0_i32_0 = arith.constant 0 : i32
    %c0_i32_1 = arith.constant 0 : i32
    return %c0_i32, %c0_i32_0 : i32, i32
  }
  func.func @transform_6(%arg0: i32, %arg1: memref<48xi32, #tpu.memory_space<smem>>, %arg2: memref<48xi32, #tpu.memory_space<smem>>) -> (i32, i32) {
    %c0_i32 = arith.constant 0 : i32
    %c0_i32_0 = arith.constant 0 : i32
    %c0_i32_1 = arith.constant 0 : i32
    return %c0_i32, %c0_i32_0 : i32, i32
  }
  func.func @transform_7(%arg0: i32, %arg1: memref<48xi32, #tpu.memory_space<smem>>, %arg2: memref<48xi32, #tpu.memory_space<smem>>) -> (i32, i32) {
    %c0_i32 = arith.constant 0 : i32
    %c0_i32_0 = arith.constant 0 : i32
    %c0_i32_1 = arith.constant 0 : i32
    return %c0_i32, %c0_i32_0 : i32, i32
  }
  func.func @transform_8(%arg0: i32, %arg1: memref<48xi32, #tpu.memory_space<smem>>, %arg2: memref<48xi32, #tpu.memory_space<smem>>) -> (i32, i32) {
    %c0_i32 = arith.constant 0 : i32
    %c0_i32_0 = arith.constant 0 : i32
    %c0_i32_1 = arith.constant 0 : i32
    return %c0_i32, %c0_i32_0 : i32, i32
  }
  func.func @transform_9(%arg0: i32, %arg1: memref<48xi32, #tpu.memory_space<smem>>, %arg2: memref<48xi32, #tpu.memory_space<smem>>) -> (i32, i32) {
    %c0_i32 = arith.constant 0 : i32
    %c0_i32_0 = arith.constant 0 : i32
    %c0_i32_1 = arith.constant 0 : i32
    return %c0_i32, %c0_i32_0 : i32, i32
  }
  func.func @transform_10(%arg0: i32, %arg1: memref<48xi32, #tpu.memory_space<smem>>, %arg2: memref<48xi32, #tpu.memory_space<smem>>) -> (i32, i32) {
    %c0_i32 = arith.constant 0 : i32
    %c0_i32_0 = arith.constant 0 : i32
    %c0_i32_1 = arith.constant 0 : i32
    return %c0_i32, %c0_i32_0 : i32, i32
  }
  func.func @transform_11(%arg0: i32, %arg1: memref<48xi32, #tpu.memory_space<smem>>, %arg2: memref<48xi32, #tpu.memory_space<smem>>) -> (i32, i32) {
    %c0_i32 = arith.constant 0 : i32
    %c0_i32_0 = arith.constant 0 : i32
    %c0_i32_1 = arith.constant 0 : i32
    return %c0_i32, %c0_i32_0 : i32, i32
  }
  func.func @transform_12(%arg0: i32, %arg1: memref<48xi32, #tpu.memory_space<smem>>, %arg2: memref<48xi32, #tpu.memory_space<smem>>) -> (i32, i32) {
    %c0_i32 = arith.constant 0 : i32
    %c0_i32_0 = arith.constant 0 : i32
    %c0_i32_1 = arith.constant 0 : i32
    return %c0_i32, %c0_i32_0 : i32, i32
  }
  func.func @transform_13(%arg0: i32, %arg1: memref<48xi32, #tpu.memory_space<smem>>, %arg2: memref<48xi32, #tpu.memory_space<smem>>) -> (i32, i32) {
    %c0_i32 = arith.constant 0 : i32
    %c0_i32_0 = arith.constant 0 : i32
    %c0_i32_1 = arith.constant 0 : i32
    return %c0_i32, %c0_i32_0 : i32, i32
  }
  func.func @transform_14(%arg0: i32, %arg1: memref<48xi32, #tpu.memory_space<smem>>, %arg2: memref<48xi32, #tpu.memory_space<smem>>) -> (i32, i32) {
    %c0_i32 = arith.constant 0 : i32
    %c0_i32_0 = arith.constant 0 : i32
    %c0_i32_1 = arith.constant 0 : i32
    return %c0_i32, %c0_i32_0 : i32, i32
  }
  func.func @transform_15(%arg0: i32, %arg1: memref<48xi32, #tpu.memory_space<smem>>, %arg2: memref<48xi32, #tpu.memory_space<smem>>) -> (i32, i32) {
    %c0_i32 = arith.constant 0 : i32
    %c0_i32_0 = arith.constant 0 : i32
    %c0_i32_1 = arith.constant 0 : i32
    return %c0_i32, %c0_i32_0 : i32, i32
  }
  func.func @transform_16(%arg0: i32, %arg1: memref<48xi32, #tpu.memory_space<smem>>, %arg2: memref<48xi32, #tpu.memory_space<smem>>) -> (i32, i32) {
    %c0_i32 = arith.constant 0 : i32
    %c0_i32_0 = arith.constant 0 : i32
    %c0_i32_1 = arith.constant 0 : i32
    return %c0_i32, %c0_i32_0 : i32, i32
  }
  func.func @transform_17(%arg0: i32, %arg1: memref<48xi32, #tpu.memory_space<smem>>, %arg2: memref<48xi32, #tpu.memory_space<smem>>) -> (i32, i32) {
    %c0_i32 = arith.constant 0 : i32
    %c0_i32_0 = arith.constant 0 : i32
    %c0_i32_1 = arith.constant 0 : i32
    return %c0_i32, %c0_i32_0 : i32, i32
  }
  func.func @transform_18(%arg0: i32, %arg1: memref<48xi32, #tpu.memory_space<smem>>, %arg2: memref<48xi32, #tpu.memory_space<smem>>) -> (i32, i32) {
    %c0_i32 = arith.constant 0 : i32
    %c0_i32_0 = arith.constant 0 : i32
    %c0_i32_1 = arith.constant 0 : i32
    return %c0_i32, %c0_i32_0 : i32, i32
  }
  func.func @transform_19(%arg0: i32, %arg1: memref<48xi32, #tpu.memory_space<smem>>, %arg2: memref<48xi32, #tpu.memory_space<smem>>) -> (i32, i32) {
    %c0_i32 = arith.constant 0 : i32
    %c0_i32_0 = arith.constant 0 : i32
    %c0_i32_1 = arith.constant 0 : i32
    return %c0_i32, %c0_i32_0 : i32, i32
  }
  func.func @transform_20(%arg0: i32, %arg1: memref<48xi32, #tpu.memory_space<smem>>, %arg2: memref<48xi32, #tpu.memory_space<smem>>) -> (i32, i32) {
    %c0_i32 = arith.constant 0 : i32
    %c0_i32_0 = arith.constant 0 : i32
    %c0_i32_1 = arith.constant 0 : i32
    return %c0_i32, %c0_i32_0 : i32, i32
  }
  func.func @transform_21(%arg0: i32, %arg1: memref<48xi32, #tpu.memory_space<smem>>, %arg2: memref<48xi32, #tpu.memory_space<smem>>) -> (i32, i32) {
    %c0_i32 = arith.constant 0 : i32
    %c0_i32_0 = arith.constant 0 : i32
    %c0_i32_1 = arith.constant 0 : i32
    return %c0_i32, %c0_i32_0 : i32, i32
  }
  func.func @transform_22(%arg0: i32, %arg1: memref<48xi32, #tpu.memory_space<smem>>, %arg2: memref<48xi32, #tpu.memory_space<smem>>) -> (i32, i32) {
    %c0_i32 = arith.constant 0 : i32
    %c0_i32_0 = arith.constant 0 : i32
    %c0_i32_1 = arith.constant 0 : i32
    return %c0_i32, %c0_i32_0 : i32, i32
  }
}

</mosaic_0001>

<bundles_post_ra>
// kernel: tpu_custom_call.1
= control target key start
LH: loop header
LB: loop body
LE: loop exit
PB: predicated region body
PF: predicated region fallthrough
CT: control target
= control target key end

     0   :  { %s3278_s29 = smov [#allocation7]   ;;  %s3819_s0 = inlined_call_operand.vmem [shape: s32[48], index: 0, kind: input, shape index: {}]   ;;  %s3820_s2 = inlined_call_operand.vmem [shape: f32[16,28], index: 2, kind: input, shape index: {}]   ;;  %s3821_s3 = inlined_call_operand.vmem [shape: f32[48,14], index: 3, kind: input, shape index: {}]   ;;  %s3822_s4 = inlined_call_operand.vmem [shape: f32[16,1], index: 4, kind: input, shape index: {}]   ;;  %s3823_s5 = inlined_call_operand.hbm [shape: f32[4,10], index: 5, kind: input, shape index: {}]   ;;  %s3824_s6 = inlined_call_operand.hbm [shape: f32[2,10], index: 6, kind: input, shape index: {}]   ;;  %s3825_s7 = inlined_call_operand.hbm [shape: f32[4,10], index: 7, kind: input, shape index: {}]   ;;  %s3826_s8 = inlined_call_operand.vmem [shape: f32[10,4], index: 8, kind: input, shape index: {}]   ;;  %s3827_s9 = inlined_call_operand.vmem [shape: f32[16,16], index: 9, kind: input, shape index: {}]   ;;  %s3828_s10 = inlined_call_operand.hbm [shape: f32[8,16], index: 10, kind: input, shape index: {}]   ;;  %s3829_s11 = inlined_call_operand.vmem [shape: f32[16,16], index: 11, kind: input, shape index: {}]   ;;  %s3830_s12 = inlined_call_operand.vmem [shape: f32[10,16], index: 12, kind: input, shape index: {}]   ;;  %s3831_s13 = inlined_call_operand.hbm [shape: f32[1,16], index: 13, kind: input, shape index: {}]   ;;  %s3832_s14 = inlined_call_operand.hbm [shape: f32[4,4], index: 14, kind: input, shape index: {}]   ;;  %s3833_s15 = inlined_call_operand.hbm [shape: f32[4,4], index: 15, kind: input, shape index: {}]   ;;  %s3834_s16 = inlined_call_operand.vmem [shape: f32[16,16], index: 16, kind: input, shape index: {}]   ;;  %s3835_s17 = inlined_call_operand.hbm [shape: f32[4,16], index: 17, kind: input, shape index: {}]   ;;  %s3836_s18 = inlined_call_operand.hbm [shape: f32[1,16], index: 18, kind: input, shape index: {}]   ;;  %s3837_s19 = inlined_call_operand.hbm [shape: f32[4,4], index: 19, kind: input, shape index: {}]   ;;  %s3838_s20 = inlined_call_operand.hbm [shape: f32[4,4], index: 20, kind: input, shape index: {}]   ;;  %s3839_s21 = inlined_call_operand.vmem [shape: f32[16,16], index: 21, kind: input, shape index: {}]   ;;  %s3840_s22 = inlined_call_operand.vmem [shape: f32[4,16], index: 22, kind: input, shape index: {}]   ;;  %s3841_s23 = inlined_call_operand.hbm [shape: f32[1,16], index: 23, kind: input, shape index: {}]   ;;  %s3842_s24 = inlined_call_operand.hbm [shape: f32[16,28], index: 24, kind: output, shape index: {}]   ;;  %s3843_s1 = inlined_call_operand.hbm [shape: s32[48], index: 1, kind: input, shape index: {}]  }
   0x1   :  { %3849 = sst [smem:[#allocation39_spill]] %s3819_s0  ;;  %s3279_s0 = smov [#allocation8]  }
   0x2   :  { %3850 = sst [smem:[#allocation40_spill]] %s3820_s2 }
   0x3   :  { %3851 = sst [smem:[#allocation41_spill]] %s3821_s3  ;;  %s35_s3 = sshll.u32 %s3843_s1, 4  ;;  %s36_s3 = int_to_ptr.hbm [resolvable:$true] %s35_s3 }
   0x4   :  { %3852 = sst [smem:[#allocation42_spill]] %s3822_s4 }
   0x5   :  { %3853 = sst [smem:[#allocation43_spill]] %s3823_s5 }
   0x6   :  { %3854 = sst [smem:[#allocation44_spill]] %s3824_s6 }
   0x7   :  { %3855 = sst [smem:[#allocation45_spill]] %s3825_s7 }
   0x8   :  { %3856 = sst [smem:[#allocation46_spill]] %s3826_s8 }
   0x9   :  { %3857 = sst [smem:[#allocation47_spill]] %s3827_s9 }
   0xa   :  { %3858 = sst [smem:[#allocation48_spill]] %s3828_s10 }
   0xb   :  { %3859 = sst [smem:[#allocation49_spill]] %s3832_s14 }
   0xc   :  { %3860 = sst [smem:[#allocation50_spill]] %s3834_s16 }
   0xd   :  { %s3861_s27 = sld [smem:[#allocation39_spill]] }
  0x13   :  { %s30_s16 = sshll.u32 %s3861_s27, 4  ;;  %s31_s16 = int_to_ptr.vmem [resolvable:$true] %s30_s16 }
  0x14   :  { %33 = dma.vmem_to_smem %s31_s16, 16, %s3278_s29, [#allocation6] }
  0x15   :  { %38 = dma.hbm_to_smem %s36_s3, 16, %s3279_s0, [#allocation6] }
  0x16   :  { %3232 = dma.done.wait [#allocation6], 32 }
  0x17   :  { %3233 = vsyncadd [#allocation6], 4294967264 }
  0x18   :  { %41 = sfence }
  0x19   :  { %42 = vsyncpa [#allocation10], 0 }
  0x1a   :  { %43 = vsyncpa [#allocation13], 0 }
  0x1b   :  { %44 = vsyncpa [#allocation16], 0 }
  0x1c   :  { %45 = vsyncpa [#allocation19], 0 }
  0x1d   :  { %46 = vsyncpa [#allocation22], 0 }
  0x1e   :  { %47 = vsyncpa [#allocation25], 0 }
  0x1f   :  { %48 = vsyncpa [#allocation28], 0 }
  0x20   :  { %49 = vsyncpa [#allocation11], 0  ;;  %s3437_s8 = smov 0  }
  0x21 LB: > { %s3862_s30 = sld [smem:[#allocation44_spill]]  ;;  %s3446_s25 = sadd.s32 4294967295, %s3268_s8   ;;  %s3268_s8 = sphi %s3437_s8, %s55_s8  }
  0x22   : > { %p2469_p0 = scmp.ge.s32.totalorder %s3268_s8, 1  ;;  %p548_p1 = scmp.lt.s32.totalorder %s3268_s8, 4 }
  0x23   : > { %p2470_p2 = scmp.ne.s32.totalorder %s3446_s25, 0  ;;  %p2690_p3 = scmp.eq.s32.totalorder %s3446_s25, 0 }
  0x24   : > { %p3452_p4 = pnand %p2469_p0, %p548_p1  ;;  %s3280_s5 = smov [#allocation12]  }
  0x25   : > { %s580_s2 = sshll.u32 %s3280_s5, 4  ;;  %s3864_s10 = sld [smem:[#allocation48_spill]]  ;;  %s581_s2 = int_to_ptr.vmem [resolvable:$true] %s580_s2 }
  0x26   : > { %p2653_p5 = pneg %p3452_p4  ;;  %s3865_s14 = sld [smem:[#allocation49_spill]] }
  0x27   : > { %s578_s4 = sshll.u32 %s3862_s30, 4  ;;  %s3281_s0 = smov [#allocation15]   ;;  %s579_s4 = int_to_ptr.hbm [resolvable:$true] %s578_s4 }
  0x28   : > { %p3466_p6 = pnand %p2690_p3, %p2653_p5  ;;  %s610_s1 = sshll.u32 %s3281_s0, 4  ;;  %s611_s1 = int_to_ptr.vmem [resolvable:$true] %s610_s1 }
  0x29   : > { %s3282_s16 = smov [#allocation18]   ;;  %s665_s26 = sshll.u32 %s3835_s17, 4  ;;  %s666_s26 = int_to_ptr.hbm [resolvable:$true] %s665_s26 }
  0x2a   : > { %2659 = dma.hbm_to_vmem [thread:$0]  (!%p3466_p6), %s579_s4, 32, %s581_s2, [#allocation13]  }
  0x2b   : > { %s608_s27 = sshll.u32 %s3864_s10, 4  ;;  %s640_s30 = sshll.u32 %s3282_s16, 4  ;;  %s609_s27 = int_to_ptr.hbm [resolvable:$true] %s608_s27  ;;  %s641_s30 = int_to_ptr.vmem [resolvable:$true] %s640_s30 }
  0x2c   : > { %s638_s3 = sshll.u32 %s3865_s14, 4  ;;  %s689_s0 = sshll.u32 %s3837_s19, 4  ;;  %s639_s3 = int_to_ptr.hbm [resolvable:$true] %s638_s3  ;;  %s690_s0 = int_to_ptr.hbm [resolvable:$true] %s689_s0 }
  0x2d   : > { %2665 = dma.hbm_to_vmem [thread:$0]  (!%p3466_p6), %s609_s27, 128, %s611_s1, [#allocation16]  }
  0x2e   : > { %2671 = dma.hbm_to_vmem [thread:$0]  (!%p3466_p6), %s639_s3, 64, %s641_s30, [#allocation19]  }
  0x2f   : > { %s3283_s10 = smov [#allocation21]   ;;  %s3284_s2 = smov [#allocation24]  }
  0x30   : > { %s667_s4 = sshll.u32 %s3283_s10, 4  ;;  %s691_s27 = sshll.u32 %s3284_s2, 4  ;;  %s668_s4 = int_to_ptr.vmem [resolvable:$true] %s667_s4  ;;  %s692_s27 = int_to_ptr.vmem [resolvable:$true] %s691_s27 }
  0x31   : > { %2677 = dma.hbm_to_vmem [thread:$0]  (!%p3466_p6), %s666_s26, 64, %s668_s4, [#allocation22]  }
  0x32   : > { %s3867_s5 = sld [smem:[#allocation43_spill]]  ;;  %s3285_s10 = smov [#allocation9]  }
  0x33   : > { %2683 = dma.hbm_to_vmem [thread:$0]  (!%p3466_p6), %s690_s0, 64, %s692_s27, [#allocation25]  }
  0x34   : > { %s3868_s28 = sld [smem:[#allocation45_spill]]  ;;  %s568_s14 = sshll.u32 %s3285_s10, 4  ;;  %s569_s14 = int_to_ptr.vmem [resolvable:$true] %s568_s14 }
  0x35   : > { %s3286_s26 = smov [#allocation14]   ;;  %s626_s16 = sshll.u32 %s3831_s13, 4  ;;  %s627_s16 = int_to_ptr.hbm [resolvable:$true] %s626_s16 }
  0x36   : > { %s592_s4 = sshll.u32 %s3286_s26, 4  ;;  %s3287_s3 = smov [#allocation17]   ;;  %s593_s4 = int_to_ptr.vmem [resolvable:$true] %s592_s4 }
  0x37   : > { %s628_s30 = sshll.u32 %s3287_s3, 4  ;;  %s677_s26 = sshll.u32 %s3836_s18, 4  ;;  %s629_s30 = int_to_ptr.vmem [resolvable:$true] %s628_s30  ;;  %s678_s26 = int_to_ptr.hbm [resolvable:$true] %s677_s26 }
  0x38   : > { %s566_s6 = sshll.u32 %s3867_s5, 4  ;;  %s650_s5 = sshll.u32 %s3833_s15, 4  ;;  %s567_s6 = int_to_ptr.hbm [resolvable:$true] %s566_s6  ;;  %s651_s5 = int_to_ptr.hbm [resolvable:$true] %s650_s5 }
  0x39   : > { %2656 = dma.hbm_to_vmem [thread:$0]  (!%p3466_p6), %s567_s6, 64, %s569_s14, [#allocation10]  }
  0x3a   : > { %s590_s7 = sshll.u32 %s3868_s28, 4  ;;  %s3288_s14 = smov [#allocation20]   ;;  %s591_s7 = int_to_ptr.hbm [resolvable:$true] %s590_s7 }
  0x3b   : > { %2662 = dma.hbm_to_vmem [thread:$0]  (!%p3466_p6), %s591_s7, 64, %s593_s4, [#allocation13]  }
  0x3c   : > { %2668 = dma.hbm_to_vmem [thread:$0]  (!%p3466_p6), %s627_s16, 16, %s629_s30, [#allocation16]  }
  0x3d   : > { %s652_s6 = sshll.u32 %s3288_s14, 4  ;;  %s701_s2 = sshll.u32 %s3838_s20, 4  ;;  %s653_s6 = int_to_ptr.vmem [resolvable:$true] %s652_s6  ;;  %s702_s2 = int_to_ptr.hbm [resolvable:$true] %s701_s2 }
  0x3e   : > { %2674 = dma.hbm_to_vmem [thread:$0]  (!%p3466_p6), %s651_s5, 64, %s653_s6, [#allocation19]  }
  0x3f   : > { %s3289_s1 = smov [#allocation23]   ;;  %s3290_s16 = smov [#allocation26]  }
  0x40   : > { %s679_s0 = sshll.u32 %s3289_s1, 4  ;;  %s703_s27 = sshll.u32 %s3290_s16, 4  ;;  %s680_s0 = int_to_ptr.vmem [resolvable:$true] %s679_s0  ;;  %s704_s27 = int_to_ptr.vmem [resolvable:$true] %s703_s27 }
  0x41   : > { %2680 = dma.hbm_to_vmem [thread:$0]  (!%p3466_p6), %s678_s26, 16, %s680_s0, [#allocation22]  }
  0x42   : > { %s719_s14 = sshll.u32 %s3841_s23, 4  ;;  %s3291_s5 = smov [#allocation27]   ;;  %s720_s14 = int_to_ptr.hbm [resolvable:$true] %s719_s14 }
  0x43   : > { %2686 = dma.hbm_to_vmem [thread:$0]  (!%p3466_p6), %s702_s2, 64, %s704_s27, [#allocation25]  }
  0x44   : > { %s721_s6 = sshll.u32 %s3291_s5, 4  ;;  %743 = sbr.rel (%p3452_p4) target bundleno = 1440 (0x5a0), region = 108  ;;  %s722_s6 = int_to_ptr.vmem [resolvable:$true] %s721_s6 }
  0x45   : > { %2689 = dma.hbm_to_vmem [thread:$0]  (!%p3466_p6), %s720_s14, 16, %s722_s6, [#allocation28]  }
  0x49   : > { %3235 = dma.done.wait (%p2690_p3), [#allocation10], 64  }
  0x4a   : > { %3237 = vsyncadd (%p2690_p3), [#allocation10], 4294967232 }
  0x4b   : > { %3239 = dma.done.wait (%p2690_p3), [#allocation13], 96  }
  0x4c   : > { %3241 = vsyncadd (%p2690_p3), [#allocation13], 4294967200 }
  0x4d   : > { %3243 = dma.done.wait (%p2690_p3), [#allocation16], 144  }
  0x4e   : > { %3245 = vsyncadd (%p2690_p3), [#allocation16], 4294967152 }
  0x4f   : > { %3247 = dma.done.wait (%p2690_p3), [#allocation19], 128  }
  0x50   : > { %3249 = vsyncadd (%p2690_p3), [#allocation19], 4294967168 }
  0x51   : > { %3251 = dma.done.wait (%p2690_p3), [#allocation22], 80  }
  0x52   : > { %3253 = vsyncadd (%p2690_p3), [#allocation22], 4294967216 }
  0x53   : > { %3255 = dma.done.wait (%p2690_p3), [#allocation25], 128  }
  0x54   : > { %3257 = vsyncadd (%p2690_p3), [#allocation25], 4294967168 }
  0x55   : > { %3259 = dma.done.wait (%p2690_p3), [#allocation28], 16  }
  0x56   : > { %3261 = vsyncadd (%p2690_p3), [#allocation28], 4294967280  ;;  %s2496_s9 = sshll.u32 %s3446_s25, 1  ;;  %s3869_s26 = sld [smem:[#allocation41_spill]] }
  0x57   : > { %p857_p7 = scmp.lt.s32.totalorder %s2496_s9, 5 }
  0x58   : > { %865 = sbr.rel (%p2470_p2) target bundleno = 96 (0x60), region = 160 }
  0x59   : > { %s3876_s9 = smov (!%p857_p7, %s2496_s9), 5 }
  0x5a   : > { %s2497_s29 = sshll.u32 %s3876_s9, 3 }
  0x5c   : > { %s3555_s7 = scalar_lea.vmem %s3869_s26, %s2497_s29 }
  0x5d   : > { %vm866_vm0 = vcmask 228352   ;;  %v3292_v0 = vmov 0.0  }
  0x5e   : > { %867 = vst.msk [vmem:[#allocation2] sm:$0xff] %vm866_vm0, %v3292_v0 }
  0x5f   : > { %868 = vst.msk [vmem:[#allocation2 + $0x8] sm:$0xff] %vm866_vm0, %v3292_v0 }
  0x60 PF: > { %s3270_s4 = smov 0  }
  0x61 LB: >> { %s2499_s2 = sshll.u32 %s3446_s25, 4  ;;  %vm882_vm1 = vcmask 221184   ;;  %s3870_s30 = sld [smem:[#allocation40_spill]]  ;;  %s3272_s4 = sphi %s3270_s4, %s874_s4  }
  0x62   : >> { %s876_s1 = sadd.s32 %s3272_s4, %s2499_s2  ;;  %s881_s29 = scalar_lea.vmem [#allocation3], %s3272_s4 }
  0x63   : >> { %s877_s0 = sld [smem:[#allocation7 + %s876_s1]]  ;;  %s886_s28 = scalar_lea.vmem [#allocation4], %s3272_s4 }
  0x64   : >> { %s878_s16 = sld [smem:[#allocation8 + %s876_s1]]  ;;  %s874_s4 = sadd.s32 1, %s3272_s4  }
  0x65   : >> { %p871_p8 = scmp.ge.s32.totalorder %s874_s4, 16  }
  0x66   : > { %v3571_v3 = vld [vmem:[%s3555_s7] sm:$0xff] (%p871_p8)  ;;  %s3293_s10 = smov (%p871_p8), 120   ;;  %s3294_s26 = smov (%p871_p8), 112   ;;  %v3581_v6 = vld [vmem:[%s3555_s7 + $0x8] sm:$0xff] (%p871_p8)  ;;  %vm930_vm2 = vcmask (%p871_p8), 1041408   ;;  %vm968_vm3 = vcmask (%p871_p8), 1043456  }
  0x67   : > { %921 = vrot.lane.b32.xlu0 (%p871_p8), %v3571_v3, %s3293_s10  ;;  %s3295_s4 = smov (%p871_p8), 118   ;;  %s3296_s1 = smov (%p871_p8), 108   ;;  %v889_v9 = vld [vmem:[#allocation12] sm:$0x3] (%p871_p8)  ;;  %v888_v10 = vld [vmem:[#allocation9] sm:$0xf] (%p871_p8) }
  0x68   : > { %873 = sbr.rel (!%p871_p8) target bundleno = 97 (0x61), region = 212  ;;  %s3297_s7 = smov (%p871_p8), 116   ;;  %2500 = vmatpush.msk.msra.mxu0 (%p871_p8), %vm930_vm2, %v889_v9  ;;  %2503 = vmatpush.msk.msra.mxu1 (%p871_p8), %vm968_vm3, %v888_v10  ;;  %v890_v11 = vld [vmem:[#allocation14] sm:$0xf] (%p871_p8)  ;;  %vm963_vm4 = vcmask (%p871_p8), 31744   ;;  %vm925_vm5 = vcmask (%p871_p8), 15360  }
  0x69   : >> { %s879_s14 = scalar_lea.vmem %s3870_s30, %s877_s0  ;;  %s3298_s0 = smov (%p871_p8), 104   ;;  %2506 = vmatpush.msk.msra.mxu2 (%p871_p8), %vm968_vm3, %v890_v11  ;;  %2509 = vmatpush.msk.msra.mxu3 (%p871_p8), %vm930_vm2, %v889_v9  ;;  %vm1259_vm6 = vcmask (%p871_p8), 130048   ;;  %v895_v34 = vld [vmem:[#allocation15] sm:$0xff] (%p871_p8)  ;;  %vm1292_vm7 = vcmask (%p871_p8), 64512   ;;  %v896_v36 = vld [vmem:[%s3829_s11] sm:$0xff] (%p871_p8)  ;;  %vm1351_vm8 = vcmask (%p871_p8), 80896  }
  0x6a   : >> { %v880_v1 = vld [vmem:[%s879_s14] sm:$0x1]  ;;  %s884_s9 = scalar_lea.vmem %s3870_s30, %s878_s16  ;;  %2512 = vmatpush.msk.msrb.mxu0 (%p871_p8), %vm968_vm3, %v888_v10  ;;  %2515 = vmatpush.msk.msrb.mxu1 (%p871_p8), %vm968_vm3, %v890_v11  ;;  %s3871_s3 = sld [smem:[#allocation47_spill]] (%p871_p8)  ;;  %v897_v35 = vld [vmem:[%s3829_s11 + $0x8] sm:$0xff] (%p871_p8) }
  0x6b   : >> { %883 = vst.msk [vmem:[%s881_s29] sm:$0x1] %vm882_vm1, %v880_v1  ;;  %v885_v2 = vld [vmem:[%s884_s9] sm:$0x1]  ;;  %2518 = vmatpush.msk.msrb.mxu2 (%p871_p8), %vm930_vm2, %v889_v9  ;;  %2521 = vmatpush.msk.msrb.mxu3 (%p871_p8), %vm968_vm3, %v888_v10  ;;  %s3872_s29 = sld [smem:[#allocation46_spill]] (%p871_p8)  ;;  %s3299_s27 = smov (%p871_p8), 16  }
  0x6c   : >> { %887 = vst.msk [vmem:[%s886_s28] sm:$0x1] %vm882_vm1, %v885_v2  ;;  %v899_v49 = vld [vmem:[%s3830_s12 + $0x8] sm:$0x3] (%p871_p8)  ;;  %v898_v50 = vld [vmem:[%s3830_s12] sm:$0xff] (%p871_p8)  ;;  %s3873_s9 = sld [smem:[#allocation50_spill]] (%p871_p8) }
  0x6d   : > { %s3300_s14 = smov 20   ;;  %s3301_s5 = smov 24  }
  0x6e   : > { %s3274_s6 = smov 0  }
  0x6f   : > { %923 = vrot.lane.b32.xlu0 %v3581_v6, %s3293_s10 }
  0x70   : > { %v894_v21 = vld [vmem:[%s3871_s3 + $0x8] sm:$0xff]  ;;  %v893_v22 = vld [vmem:[%s3871_s3] sm:$0xff] }
  0x71   : > { %v892_v32 = vld [vmem:[%s3872_s29 + $0x8] sm:$0x3]  ;;  %v891_v33 = vld [vmem:[%s3872_s29] sm:$0xff] }
  0x72   : > { %v3577_v5 = vld [vmem:[#allocation3] sm:$0xff]  ;;  %v3590_v8 = vld [vmem:[#allocation3 + $0x8] sm:$0xff] }
  0x73   : > { %v3573_v4 = vld [vmem:[#allocation4] sm:$0xff]  ;;  %959 = vrot.lane.b32.xlu2 %v3577_v5, %s3294_s26  ;;  %v3583_v7 = vld [vmem:[#allocation4 + $0x8] sm:$0xff] }
  0x74   : > { %997 = vrot.lane.b32.xlu1 %v3573_v4, %s3294_s26 }
  0x77   : > { %1035 = vrot.lane.b32.xlu0 %v3581_v6, %s3295_s4 }
  0x7b   : > { %999 = vrot.lane.b32.xlu2 %v3583_v7, %s3294_s26 }
  0x7c   : > { %1033 = vrot.lane.b32.xlu1 %v3571_v3, %s3295_s4 }
  0x7f   : > { %1066 = vrot.lane.b32.xlu0 %v3590_v8, %s3296_s1 }
  0x83   : > { %961 = vrot.lane.b32.xlu2 %v3590_v8, %s3294_s26 }
  0x84   : > { %1064 = vrot.lane.b32.xlu1 %v3577_v5, %s3296_s1 }
  0x87   : > { %1095 = vrot.lane.b32.xlu0 %v3573_v4, %s3296_s1 }
  0x8b   : > { %1159 = vrot.lane.b32.xlu2 %v3577_v5, %s3298_s0 }
  0x8c   : > { %1128 = vrot.lane.b32.xlu1 %v3571_v3, %s3297_s7 }
  0x8f   : > { %1190 = vrot.lane.b32.xlu0 %v3573_v4, %s3298_s0 }
  0x93   : > { %1161 = vrot.lane.b32.xlu2 %v3590_v8, %s3298_s0 }
  0x94   : > { %1130 = vrot.lane.b32.xlu1 %v3581_v6, %s3297_s7 }
  0x9b   : > { %1192 = vrot.lane.b32.xlu2 %v3583_v7, %s3298_s0 }
  0x9c   : > { %1097 = vrot.lane.b32.xlu1 %v3583_v7, %s3296_s1 }
  0xcd   : > { %v960_v12 = vpop.permute.xlu2 %959 }
  0xce   : > { %2504 = vmatmul.msk.f32.vlgmr.msra.gmra.mxu1 %vm963_vm4, %v960_v12 }
  0xcf   : > { %1278 = vmatpush.msra.mxu1 %v894_v21 }
  0xd1   : > { %1279 = vmatpush.msra.mxu1 %v893_v22 }
  0xd5   : > { %v1000_v13 = vpop.permute.xlu2 %999 }
  0xd9   : > { %v922_v15 = vpop.permute.xlu0 %921 }
  0xda   : > { %2501 = vmatmul.msk.f32.vlgmr.msra.gmra.mxu0 %vm925_vm5, %v922_v15 }
  0xdb   : > { %2524 = vmatpush.msk.msra.mxu0 %vm968_vm3, %v890_v11 }
  0xdd   : > { %v962_v14 = vpop.permute.xlu2 %961 }
  0xde   : > { %2505 = vmatmul.msk.f32.gmra.mxu1 %vm963_vm4, %v962_v14 }
  0xe1   : > { %v924_v17 = vpop.permute.xlu0 %923 }
  0xe2   : > { %2502 = vmatmul.msk.f32.gmra.mxu0 %vm925_vm5, %v924_v17 }
  0xe5   : > { %v1160_v23 = vpop.permute.xlu2 %1159 }
  0xe6   : > { %v998_v16 = vpop.permute.xlu1 %997 }
  0xe7   : > { %2507 = vmatmul.msk.f32.vlgmr.msra.gmra.mxu2 %vm963_vm4, %v998_v16 }
  0xe8   : > { %1312 = vmatpush.msra.mxu2 %v895_v34 }
  0xe9   : > { %v1036_v19 = vpop.permute.xlu0 %1035 }
  0xed   : > { %v1162_v26 = vpop.permute.xlu2 %1161 }
  0xee   : > { %v1034_v18 = vpop.permute.xlu1 %1033 }
  0xef   : > { %2508 = vmatmul.msk.f32.gmra.mxu2 %vm963_vm4, %v1000_v13  ;;  %2510 = vmatmul.msk.f32.vlgmr.msra.gmra.mxu3 %vm925_vm5, %v1034_v18 }
  0xf0   : > { %1340 = vmatpush.msra.mxu3 %v897_v35 }
  0xf1   : > { %v1067_v24 = vpop.permute.xlu0 %1066 }
  0xf2   : > { %1341 = vmatpush.msra.mxu3 %v896_v36 }
  0xf5   : > { %v1193_v31 = vpop.permute.xlu2 %1192 }
  0xf6   : > { %v1065_v20 = vpop.permute.xlu1 %1064 }
  0xf7   : > { %2513 = vmatmul.msk.f32.vlgmr.msrb.gmra.mxu0 %vm963_vm4, %v1065_v20  ;;  %2511 = vmatmul.msk.f32.gmra.mxu3 %vm925_vm5, %v1036_v19 }
  0xf8   : > { %2533 = vmatpush.msk.msrb.mxu0 %vm930_vm2, %v899_v49 }
  0xf9   : > { %v1096_v27 = vpop.permute.xlu0 %1095 }
  0xfa   : > { %2516 = vmatmul.msk.f32.vlgmr.msrb.gmra.mxu1 %vm963_vm4, %v1096_v27  ;;  %1376 = vmatpush.msrb.mxu0 %v898_v50 }
  0xfb   : > { %2536 = vmatpush.msk.msrb.mxu1 %vm930_vm2, %v892_v32 }
  0xfd   : > { %1410 = vmatpush.msrb.mxu1 %v891_v33 }
  0xfe   : > { %v1129_v25 = vpop.permute.xlu1 %1128 }
  0xff   : > { %2514 = vmatmul.msk.f32.gmra.mxu0 %vm963_vm4, %v1067_v24  ;;  %2519 = vmatmul.msk.f32.vlgmr.msrb.gmra.mxu2 %vm925_vm5, %v1129_v25 }
 0x100   : > { %2522 = vmatmul.msk.f32.vlgmr.msrb.gmra.mxu3 %vm963_vm4, %v1160_v23  ;;  %2539 = vmatpush.msk.msrb.mxu2 %vm930_vm2, %v892_v32 }
 0x101   : > { %v1191_v29 = vpop.permute.xlu0 %1190  ;;  %2542 = vmatpush.msk.msrb.mxu3 %vm930_vm2, %v892_v32 }
 0x102   : > { %1439 = vmatpush.msrb.mxu2 %v891_v33 }
 0x103   : > { %1468 = vmatpush.msrb.mxu3 %v891_v33 }
 0x106   : > { %v1131_v28 = vpop.permute.xlu1 %1130 }
 0x107   : > { %2520 = vmatmul.msk.f32.gmra.mxu2 %vm925_vm5, %v1131_v28  ;;  %2525 = vmatmul.msk.f32.vlgmr.msra.gmra.mxu0 %vm963_vm4, %v1191_v29 }
 0x108   : > { %2523 = vmatmul.msk.f32.gmra.mxu3 %vm963_vm4, %v1162_v26 }
 0x10e   : > { %v1098_v30 = vpop.permute.xlu1 %1097 }
 0x10f   : > { %2517 = vmatmul.msk.f32.gmra.mxu1 %vm963_vm4, %v1098_v30  ;;  %2526 = vmatmul.msk.f32.gmra.mxu0 %vm963_vm4, %v1193_v31 }
 0x110   : > { %2529 = vmatmul.msk.f32.vlgmr.msra.gmra.mxu2 %vm1292_vm7, %v3571_v3  ;;  %2531 = vmatmul.msk.f32.vlgmr.msra.gmra.mxu3 %vm1259_vm6, %v3573_v4 }
 0x117   : > { %2527 = vmatmul.msk.f32.vlgmr.msra.gmra.mxu1 %vm1259_vm6, %v3577_v5 }
 0x118   : > { %2530 = vmatmul.msk.f32.gmra.mxu2 %vm1292_vm7, %v3581_v6  ;;  %2532 = vmatmul.msk.f32.gmra.mxu3 %vm1259_vm6, %v3583_v7 }
 0x11f   : > { %2528 = vmatmul.msk.f32.gmra.mxu1 %vm1259_vm6, %v3590_v8 }
 0x14b   : > { %v989_v38 = vpop.f32.mrf.mxu1 }
 0x157   : > { %v951_v37 = vpop.f32.mrf.mxu0 }
 0x158   : > { %v990_v39 = vadd.f32 %v989_v38, %v951_v37 }
 0x15b   : > { %v992_v43 = vpop.f32.mrf.mxu1 }
 0x15f   : > { %v954_v42 = vpop.f32.mrf.mxu0 }
 0x160   : > { %v993_v44 = vadd.f32 %v992_v43, %v954_v42  ;;  %v904_v43 = vld [vmem:[%s3873_s9 + $0x8] sm:$0xff] }
 0x161   : > { %1704 = vmatpush.msra.mxu3 %v904_v43 }
 0x16a   : > { %v1025_v40 = vpop.f32.mrf.mxu2 }
 0x16b   : > { %v1031_v41 = vadd.f32 %v1025_v40, %v990_v39 }
 0x16d   : > { %2537 = vmatmul.msk.f32.vlgmr.msrb.gmra.mxu1 %vm1351_vm8, %v1031_v41  ;;  %v1223_v63 = vmul.f32 %v1031_v41, %v1031_v41 }
 0x172   : > { %v1028_v45 = vpop.f32.mrf.mxu2  ;;  %v1058_v47 = vpop.f32.mrf.mxu3 }
 0x173   : > { %v1032_v46 = vadd.f32 %v1028_v45, %v993_v44  ;;  %v903_v45 = vld [vmem:[%s3873_s9] sm:$0xff] }
 0x174   : > { %v1089_v48 = vpop.f32.mrf.mxu0  ;;  %1705 = vmatpush.msra.mxu3 %v903_v45 }
 0x175   : > { %2538 = vmatmul.msk.f32.gmra.mxu1 %vm1351_vm8, %v1032_v46  ;;  %v1090_v52 = vadd.f32 %v1089_v48, %v1058_v47  ;;  %v1224_v11 = vmul.f32 %v1032_v46, %v1032_v46 }
 0x177   : > { %v1120_v54 = vpop.f32.mrf.mxu1 }
 0x178   : > { %v1126_v55 = vadd.f32 %v1120_v54, %v1090_v52 }
 0x17a   : > { %v1061_v51 = vpop.f32.mrf.mxu3  ;;  %2540 = vmatmul.msk.f32.vlgmr.msrb.gmra.mxu2 %vm1351_vm8, %v1126_v55  ;;  %v1225_v59 = vmul.f32 %v1126_v55, %v1126_v55 }
 0x17c   : > { %v1092_v53 = vpop.f32.mrf.mxu0  ;;  %v1227_v2 = vadd.f32 %v1225_v59, %v1223_v63 }
 0x17d   : > { %v1093_v58 = vadd.f32 %v1092_v53, %v1061_v51 }
 0x182   : > { %v1153_v56 = vpop.f32.mrf.mxu2 }
 0x183   : > { %v1184_v57 = vpop.f32.mrf.mxu3 }
 0x184   : > { %v1185_v60 = vadd.f32 %v1184_v57, %v1153_v56  ;;  %v1215_v62 = vpop.f32.mrf.mxu0 }
 0x186   : > { %v1221_v1 = vadd.f32 %v1215_v62, %v1185_v60 }
 0x188   : > { %v1229_v3 = vmul.f32 %v1221_v1, %v1221_v1  ;;  %2543 = vmatmul.msk.f32.vlgmr.msrb.gmra.mxu3 %vm1351_vm8, %v1221_v1 }
 0x18a   : > { %v1156_v4 = vpop.f32.mrf.mxu2  ;;  %v1231_v6 = vadd.f32 %v1229_v3, %v1227_v2 }
 0x18b   : > { %v1187_v5 = vpop.f32.mrf.mxu3 }
 0x18c   : > { %v1123_v61 = vpop.f32.mrf.mxu1  ;;  %v1233_v8 = vmax.f32 %v1231_v6, 1e-08  ;;  %v1188_v9 = vadd.f32 %v1187_v5, %v1156_v4  ;;  %v1218_v10 = vpop.f32.mrf.mxu0 }
 0x18d   : > { %v1127_v0 = vadd.f32 %v1123_v61, %v1093_v58  ;;  %v2768_v58 = vld [vmem:[#allocation17] ss:$0 sm:$0xff] }
 0x18e   : > { %2771 = vrsqrt.f32 %v1233_v8  ;;  %v1222_v12 = vadd.f32 %v1218_v10, %v1188_v9  ;;  %vm1242_vm9 = vcmp.eq.f32.partialorder %v1233_v8, inf  ;;  %v1245_v27 = vand.u32 2147483648, %v1233_v8 }
 0x18f   : > { %2541 = vmatmul.msk.f32.gmra.mxu2 %vm1351_vm8, %v1127_v0  ;;  %v1226_v7 = vmul.f32 %v1127_v0, %v1127_v0  ;;  %vm1244_vm10 = vcmp.eq.f32.partialorder %v1233_v8, 0.0 }
 0x190   : > { %v1230_v14 = vmul.f32 %v1222_v12, %v1222_v12  ;;  %2544 = vmatmul.msk.f32.gmra.mxu3 %vm1351_vm8, %v1222_v12 }
 0x191   : > { %v1228_v13 = vadd.f32 %v1226_v7, %v1224_v11 }
 0x193   : > { %v1232_v15 = vadd.f32 %v1230_v14, %v1228_v13  ;;  %v1314_v37 = vpop.f32.mrf.mxu2  ;;  %v1343_v39 = vpop.f32.mrf.mxu3 }
 0x194   : > { %v2772_v16 = vpop.eup %2771  ;;  %v1281_v38 = vpop.f32.mrf.mxu1 }
 0x195   : > { %v1234_v17 = vmax.f32 %v1232_v15, 1e-08  ;;  %v1236_v18 = vmul.f32 %v2772_v16, %v1233_v8  ;;  %v1290_v63 = vadd.f32 %v2768_v58, %v1281_v38 }
 0x197   : > { %2773 = vrsqrt.f32 %v1234_v17  ;;  %v1237_v19 = vmul.f32 %v2772_v16, %v1236_v18  ;;  %vm1254_vm11 = vcmp.eq.f32.partialorder %v1234_v17, inf  ;;  %v1257_v34 = vand.u32 2147483648, %v1234_v17 }
 0x198   : > { %vm1256_vm12 = vcmp.eq.f32.partialorder %v1234_v17, 0.0  ;;  %v1320_v3 = vadd.f32 %v1314_v37, %v1290_v63 }
 0x199   : > { %v1238_v20 = vmul.f32 0.5, %v1237_v19  ;;  %v901_v19 = vld [vmem:[#allocation18] sm:$0xf] }
 0x19a   : > { %v1349_v7 = vadd.f32 %v1343_v39, %v1320_v3  ;;  %2553 = vmatpush.msk.msra.mxu2 %vm968_vm3, %v901_v19  ;;  %2550 = vmatpush.msk.msra.mxu1 %vm968_vm3, %v901_v19 }
 0x19b   : > { %v1239_v21 = vsub.f32 1.5, %v1238_v20  ;;  %v1317_v40 = vpop.f32.mrf.mxu2  ;;  %v1346_v42 = vpop.f32.mrf.mxu3  ;;  %2547 = vmatpush.msk.msra.mxu0 %vm968_vm3, %v901_v19 }
 0x19c   : > { %v1284_v41 = vpop.f32.mrf.mxu1 }
 0x19d   : > { %v2774_v22 = vpop.eup %2773  ;;  %v1240_v23 = vmul.f32 %v2772_v16, %v1239_v21  ;;  %v1291_v6 = vadd.f32 %v2768_v58, %v1284_v41 }
 0x19e   : > { %v1248_v24 = vmul.f32 %v2774_v22, %v1234_v17 }
 0x19f   : > { %v1241_v25 = vmul.f32 %v1240_v23, %v1233_v8  ;;  %v1321_v14 = vadd.f32 %v1317_v40, %v1291_v6 }
 0x1a0   : > { %v1249_v26 = vmul.f32 %v2774_v22, %v1248_v24 }
 0x1a1   : > { %v1243_v28 = vsel %vm1242_vm9, %v1233_v8, %v1241_v25  ;;  %v1350_v23 = vadd.f32 %v1346_v42, %v1321_v14 }
 0x1a2   : > { %v1250_v29 = vmul.f32 0.5, %v1249_v26  ;;  %v1246_v30 = vsel %vm1244_vm10, %v1245_v27, %v1243_v28 }
 0x1a3   : > { %2534 = vmatmul.msk.f32.vlgmr.msrb.gmra.mxu0 %vm1351_vm8, %v1246_v30 }
 0x1a4   : > { %v1251_v31 = vsub.f32 1.5, %v1250_v29 }
 0x1a6   : > { %v1252_v32 = vmul.f32 %v2774_v22, %v1251_v31 }
 0x1a8   : > { %v1253_v33 = vmul.f32 %v1252_v32, %v1234_v17 }
 0x1aa   : > { %v1255_v35 = vsel %vm1254_vm11, %v1234_v17, %v1253_v33 }
 0x1ab   : > { %v1258_v36 = vsel %vm1256_vm12, %v1257_v34, %v1255_v35 }
 0x1ac   : > { %2535 = vmatmul.msk.f32.gmra.mxu0 %vm1351_vm8, %v1258_v36 }
 0x1ea   : > { %v3683_v46 = vpop.f32.mrf.mxu1 }
 0x1eb   : > { %v1476_v48 = vmul.f32 %v3683_v46, %v3683_v46 }
 0x1f2   : > { %v3695_v54 = vpop.f32.mrf.mxu1 }
 0x1f3   : > { %v1477_v57 = vmul.f32 %v3695_v54, %v3695_v54 }
 0x1fd   : > { %v3678_v44 = vpop.f32.mrf.mxu2 }
 0x1fe   : > { %v1478_v47 = vmul.f32 %v3678_v44, %v3678_v44 }
 0x200   : > { %v1480_v50 = vadd.f32 %v1478_v47, %v1476_v48 }
 0x20b   : > { %v3689_v49 = vpop.f32.mrf.mxu3 }
 0x20c   : > { %v1482_v51 = vmul.f32 %v3689_v49, %v3689_v49 }
 0x20e   : > { %v1484_v53 = vadd.f32 %v1482_v51, %v1480_v50 }
 0x210   : > { %v1486_v56 = vmax.f32 %v1484_v53, 1e-08 }
 0x212   : > { %v3693_v52 = vpop.f32.mrf.mxu2  ;;  %2775 = vrsqrt.f32 %v1486_v56  ;;  %vm1495_vm13 = vcmp.eq.f32.partialorder %v1486_v56, inf  ;;  %v1498_v18 = vand.u32 2147483648, %v1486_v56  ;;  %vm1497_vm14 = vcmp.eq.f32.partialorder %v1486_v56, 0.0 }
 0x213   : > { %v1479_v55 = vmul.f32 %v3693_v52, %v3693_v52  ;;  %v3701_v59 = vpop.f32.mrf.mxu3 }
 0x214   : > { %v1483_v61 = vmul.f32 %v3701_v59, %v3701_v59 }
 0x215   : > { %v1481_v60 = vadd.f32 %v1479_v55, %v1477_v57 }
 0x217   : > { %v1485_v62 = vadd.f32 %v1483_v61, %v1481_v60 }
 0x218   : > { %v2776_v0 = vpop.eup %2775 }
 0x219   : > { %v1487_v1 = vmax.f32 %v1485_v62, 1e-08  ;;  %v1489_v2 = vmul.f32 %v2776_v0, %v1486_v56 }
 0x21b   : > { %2777 = vrsqrt.f32 %v1487_v1  ;;  %v1490_v4 = vmul.f32 %v2776_v0, %v1489_v2  ;;  %vm1507_vm15 = vcmp.eq.f32.partialorder %v1487_v1, inf  ;;  %v1510_v31 = vand.u32 2147483648, %v1487_v1 }
 0x21c   : > { %vm1509_vm0 = vcmp.eq.f32.partialorder %v1487_v1, 0.0 }
 0x21d   : > { %v1491_v5 = vmul.f32 0.5, %v1490_v4  ;;  %v902_v4 = vld [vmem:[#allocation20] sm:$0xf] }
 0x21e   : > { %2564 = vmatpush.msk.msrb.mxu2 %vm968_vm3, %v902_v4  ;;  %2567 = vmatpush.msk.msrb.mxu3 %vm968_vm3, %v902_v4 }
 0x21f   : > { %v1492_v8 = vsub.f32 1.5, %v1491_v5  ;;  %2561 = vmatpush.msk.msrb.mxu1 %vm968_vm3, %v902_v4  ;;  %v905_v5 = vld [vmem:[#allocation21] sm:$0xf]  ;;  %v2769_v4 = vld [vmem:[#allocation23] ss:$0 sm:$0xff] }
 0x220   : > { %v1378_v10 = vpop.f32.mrf.mxu0  ;;  %2558 = vmatpush.msk.msrb.mxu0 %vm968_vm3, %v905_v5 }
 0x221   : > { %v2778_v9 = vpop.eup %2777  ;;  %v1493_v11 = vmul.f32 %v2776_v0, %v1492_v8  ;;  %v1384_v13 = vadd.f32 %v1378_v10, %v1349_v7 }
 0x222   : > { %v1501_v12 = vmul.f32 %v2778_v9, %v1487_v1 }
 0x223   : > { %v1494_v15 = vmul.f32 %v1493_v11, %v1486_v56  ;;  %v1556_v17 = vmax.f32 %v1384_v13, 0.0 }
 0x224   : > { %v1502_v16 = vmul.f32 %v2778_v9, %v1501_v12 }
 0x225   : > { %v1496_v20 = vsel %vm1495_vm13, %v1486_v56, %v1494_v15  ;;  %2556 = vmatmul.msk.f32.vlgmr.msra.gmra.mxu3 %vm1259_vm6, %v1556_v17 }
 0x226   : > { %v1503_v21 = vmul.f32 0.5, %v1502_v16  ;;  %v1499_v22 = vsel %vm1497_vm14, %v1498_v18, %v1496_v20 }
 0x227   : > { %v2545_v24 = vmul.f32 -1.442695, %v1499_v22 }
 0x228   : > { %v1504_v25 = vsub.f32 1.5, %v1503_v21 }
 0x229   : > { %v1381_v26 = vpop.f32.mrf.mxu0  ;;  %2779 = vpow2.f32 %v2545_v24 }
 0x22a   : > { %v1505_v27 = vmul.f32 %v2778_v9, %v1504_v25  ;;  %v1385_v28 = vadd.f32 %v1381_v26, %v1350_v23 }
 0x22c   : > { %v1506_v29 = vmul.f32 %v1505_v27, %v1487_v1  ;;  %v1557_v30 = vmax.f32 %v1385_v28, 0.0 }
 0x22e   : > { %v1508_v32 = vsel %vm1507_vm15, %v1487_v1, %v1506_v29  ;;  %2557 = vmatmul.msk.f32.gmra.mxu3 %vm1259_vm6, %v1557_v30 }
 0x22f   : > { %v1511_v33 = vsel %vm1509_vm0, %v1510_v31, %v1508_v32  ;;  %v2780_v34 = vpop.eup %2779 }
 0x230   : > { %v2546_v35 = vmul.f32 -1.442695, %v1511_v33  ;;  %v1518_v36 = vadd.f32 1.0, %v2780_v34 }
 0x232   : > { %2781 = vpow2.f32 %v2546_v35  ;;  %v1531_v42 = vand.u32 2147483648, %v1518_v36  ;;  %v1529_v45 = vand.u32 2147483647, %v1518_v36  ;;  %vm1525_vm5 = vweird.f32 %v1518_v36 }
 0x233   : > { %2783 = vrcp.f32 %v1518_v36 }
 0x234   : > { %v1532_v50 = vor.u32 1.1754944e-38, %v1531_v42  ;;  %vm1530_vm8 = vcmp.eq.f32.partialorder %v1529_v45, 8.507059e+37  ;;  %v910_v42 = vld [vmem:[%s3839_s21 + $0x8] sm:$0xff]  ;;  %v909_v45 = vld [vmem:[%s3839_s21] sm:$0xff] }
 0x235   : > { %2070 = vmatpush.msra.mxu3 %v910_v42 }
 0x237   : > { %2071 = vmatpush.msra.mxu3 %v909_v45 }
 0x238   : > { %v2782_v37 = vpop.eup %2781 }
 0x239   : > { %v2784_v38 = vpop.eup %2783  ;;  %v1519_v39 = vadd.f32 1.0, %v2782_v37 }
 0x23a   : > { %v1521_v40 = vmul.f32 %v2784_v38, %v1518_v36  ;;  %vm1526_vm2 = vweird.f32 %v2784_v38 }
 0x23b   : > { %2785 = vrcp.f32 %v1519_v39  ;;  %vm1527_vm7 = vmor %vm1525_vm5, %vm1526_vm2  ;;  %v1546_v61 = vand.u32 2147483648, %v1519_v39  ;;  %v1544_v63 = vand.u32 2147483647, %v1519_v39  ;;  %vm1540_vm10 = vweird.f32 %v1519_v39 }
 0x23c   : > { %v1522_v41 = vsub.f32 1.0, %v1521_v40 }
 0x23d   : > { %v1547_v1 = vor.u32 1.1754944e-38, %v1546_v61  ;;  %vm1545_vm12 = vcmp.eq.f32.partialorder %v1544_v63, 8.507059e+37 }
 0x23e   : > { %v1523_v43 = vmul.f32 %v2784_v38, %v1522_v41 }
 0x240   : > { %v1524_v47 = vadd.f32 %v2784_v38, %v1523_v43 }
 0x241   : > { %v2786_v48 = vpop.eup %2785 }
 0x242   : > { %v1528_v51 = vsel %vm1527_vm7, %v2784_v38, %v1524_v47  ;;  %v1536_v53 = vmul.f32 %v2786_v48, %v1519_v39  ;;  %vm1541_vm9 = vweird.f32 %v2786_v48 }
 0x243   : > { %v1533_v55 = vsel %vm1530_vm8, %v1532_v50, %v1528_v51  ;;  %vm1542_vm11 = vmor %vm1540_vm10, %vm1541_vm9 }
 0x244   : > { %v1550_v56 = vmul.f32 %v1533_v55, %v3683_v46  ;;  %v1552_v57 = vmul.f32 %v1533_v55, %v3678_v44  ;;  %v1554_v58 = vmul.f32 %v1533_v55, %v3689_v49  ;;  %v1537_v60 = vsub.f32 1.0, %v1536_v53 }
 0x246   : > { %v1538_v62 = vmul.f32 %v2786_v48, %v1537_v60  ;;  %2548 = vmatmul.msk.f32.vlgmr.msra.gmra.mxu0 %vm963_vm4, %v1550_v56  ;;  %2551 = vmatmul.msk.f32.vlgmr.msra.gmra.mxu1 %vm963_vm4, %v1552_v57 }
 0x247   : > { %2554 = vmatmul.msk.f32.vlgmr.msra.gmra.mxu2 %vm963_vm4, %v1554_v58 }
 0x248   : > { %v1539_v0 = vadd.f32 %v2786_v48, %v1538_v62 }
 0x24a   : > { %v1543_v46 = vsel %vm1542_vm11, %v2786_v48, %v1539_v0 }
 0x24b   : > { %v1548_v44 = vsel %vm1545_vm12, %v1547_v1, %v1543_v46 }
 0x24c   : > { %v1555_v49 = vmul.f32 %v1548_v44, %v3701_v59  ;;  %v1551_v2 = vmul.f32 %v1548_v44, %v3695_v54  ;;  %v1553_v3 = vmul.f32 %v1548_v44, %v3693_v52 }
 0x24e   : > { %2549 = vmatmul.msk.f32.gmra.mxu0 %vm963_vm4, %v1551_v2  ;;  %2552 = vmatmul.msk.f32.gmra.mxu1 %vm963_vm4, %v1553_v3 }
 0x24f   : > { %2555 = vmatmul.msk.f32.gmra.mxu2 %vm963_vm4, %v1555_v49 }
 0x2a8   : > { %v1707_v41 = vpop.f32.mrf.mxu3 }
 0x2b1   : > { %v1710_v43 = vpop.f32.mrf.mxu3 }
 0x2c3   : > { %v1584_v59 = vpop.f32.mrf.mxu0  ;;  %v1613_v54 = vpop.f32.mrf.mxu1 }
 0x2c4   : > { %2562 = vmatmul.msk.f32.vlgmr.msrb.gmra.mxu1 %vm963_vm4, %v1584_v59  ;;  %2565 = vmatmul.msk.f32.vlgmr.msrb.gmra.mxu2 %vm963_vm4, %v1613_v54  ;;  %v1648_v52 = vmul.f32 %v1584_v59, %v1584_v59  ;;  %v1650_v6 = vmul.f32 %v1613_v54, %v1613_v54  ;;  %v1716_v54 = vadd.f32 %v2769_v4, %v1707_v41 }
 0x2c6   : > { %v1652_v8 = vadd.f32 %v1650_v6, %v1648_v52 }
 0x2ca   : > { %v1642_v7 = vpop.f32.mrf.mxu2 }
 0x2cb   : > { %v1654_v9 = vmul.f32 %v1642_v7, %v1642_v7  ;;  %2568 = vmatmul.msk.f32.vlgmr.msrb.gmra.mxu3 %vm963_vm4, %v1642_v7  ;;  %v1587_v10 = vpop.f32.mrf.mxu0  ;;  %v1616_v11 = vpop.f32.mrf.mxu1 }
 0x2cc   : > { %2563 = vmatmul.msk.f32.gmra.mxu1 %vm963_vm4, %v1587_v10  ;;  %2566 = vmatmul.msk.f32.gmra.mxu2 %vm963_vm4, %v1616_v11  ;;  %v1649_v14 = vmul.f32 %v1587_v10, %v1587_v10  ;;  %v1651_v15 = vmul.f32 %v1616_v11, %v1616_v11 }
 0x2cd   : > { %v1656_v12 = vadd.f32 %v1654_v9, %v1652_v8 }
 0x2ce   : > { %v1653_v17 = vadd.f32 %v1651_v15, %v1649_v14  ;;  %v907_v14 = vld [vmem:[#allocation24] sm:$0xf] }
 0x2cf   : > { %v1658_v13 = vmax.f32 %v1656_v12, 1e-08  ;;  %2572 = vmatpush.msk.msra.mxu0 %vm968_vm3, %v907_v14  ;;  %2575 = vmatpush.msk.msra.mxu1 %vm968_vm3, %v907_v14 }
 0x2d0   : > { %2578 = vmatpush.msk.msra.mxu2 %vm968_vm3, %v907_v14 }
 0x2d1   : > { %2787 = vrsqrt.f32 %v1658_v13  ;;  %vm1667_vm13 = vcmp.eq.f32.partialorder %v1658_v13, inf  ;;  %v1670_v31 = vand.u32 2147483648, %v1658_v13  ;;  %vm1669_vm14 = vcmp.eq.f32.partialorder %v1658_v13, 0.0 }
 0x2d2   : > { %v1645_v16 = vpop.f32.mrf.mxu2 }
 0x2d3   : > { %v1655_v18 = vmul.f32 %v1645_v16, %v1645_v16  ;;  %2569 = vmatmul.msk.f32.gmra.mxu3 %vm963_vm4, %v1645_v16 }
 0x2d5   : > { %v1657_v19 = vadd.f32 %v1655_v18, %v1653_v17 }
 0x2d7   : > { %v2788_v20 = vpop.eup %2787  ;;  %v1659_v21 = vmax.f32 %v1657_v19, 1e-08  ;;  %v1717_v19 = vadd.f32 %v2769_v4, %v1710_v43 }
 0x2d8   : > { %v1661_v22 = vmul.f32 %v2788_v20, %v1658_v13 }
 0x2d9   : > { %2789 = vrsqrt.f32 %v1659_v21  ;;  %vm1679_vm15 = vcmp.eq.f32.partialorder %v1659_v21, inf  ;;  %v1682_v38 = vand.u32 2147483648, %v1659_v21  ;;  %vm1681_vm0 = vcmp.eq.f32.partialorder %v1659_v21, 0.0 }
 0x2da   : > { %v1662_v23 = vmul.f32 %v2788_v20, %v1661_v22 }
 0x2dc   : > { %v1663_v24 = vmul.f32 0.5, %v1662_v23 }
 0x2de   : > { %v1664_v25 = vsub.f32 1.5, %v1663_v24 }
 0x2df   : > { %v2790_v26 = vpop.eup %2789 }
 0x2e0   : > { %v1665_v27 = vmul.f32 %v2788_v20, %v1664_v25  ;;  %v1673_v28 = vmul.f32 %v2790_v26, %v1659_v21 }
 0x2e2   : > { %v1666_v29 = vmul.f32 %v1665_v27, %v1658_v13  ;;  %v1674_v30 = vmul.f32 %v2790_v26, %v1673_v28 }
 0x2e4   : > { %v1668_v32 = vsel %vm1667_vm13, %v1658_v13, %v1666_v29  ;;  %v1675_v33 = vmul.f32 0.5, %v1674_v30 }
 0x2e5   : > { %v1671_v34 = vsel %vm1669_vm14, %v1670_v31, %v1668_v32 }
 0x2e6   : > { %2559 = vmatmul.msk.f32.vlgmr.msrb.gmra.mxu0 %vm963_vm4, %v1671_v34  ;;  %v1676_v35 = vsub.f32 1.5, %v1675_v33 }
 0x2e8   : > { %v1677_v36 = vmul.f32 %v2790_v26, %v1676_v35 }
 0x2ea   : > { %v1678_v37 = vmul.f32 %v1677_v36, %v1659_v21 }
 0x2ec   : > { %v1680_v39 = vsel %vm1679_vm15, %v1659_v21, %v1678_v37 }
 0x2ed   : > { %v1683_v40 = vsel %vm1681_vm0, %v1682_v38, %v1680_v39 }
 0x2ee   : > { %2560 = vmatmul.msk.f32.gmra.mxu0 %vm963_vm4, %v1683_v40 }
 0x341   : > { %v3742_v48 = vpop.f32.mrf.mxu1 }
 0x342   : > { %v1842_v51 = vmul.f32 %v3742_v48, %v3742_v48 }
 0x347   : > { %v3740_v47 = vpop.f32.mrf.mxu2 }
 0x348   : > { %v1844_v50 = vmul.f32 %v3740_v47, %v3740_v47 }
 0x349   : > { %v3754_v60 = vpop.f32.mrf.mxu1 }
 0x34a   : > { %v1846_v55 = vadd.f32 %v1844_v50, %v1842_v51  ;;  %v1843_v63 = vmul.f32 %v3754_v60, %v3754_v60 }
 0x34e   : > { %v3748_v53 = vpop.f32.mrf.mxu3 }
 0x34f   : > { %v1848_v56 = vmul.f32 %v3748_v53, %v3748_v53  ;;  %v3752_v57 = vpop.f32.mrf.mxu2 }
 0x350   : > { %v1845_v62 = vmul.f32 %v3752_v57, %v3752_v57 }
 0x351   : > { %v1850_v58 = vadd.f32 %v1848_v56, %v1846_v55 }
 0x352   : > { %v1847_v1 = vadd.f32 %v1845_v62, %v1843_v63 }
 0x353   : > { %v1852_v61 = vmax.f32 %v1850_v58, 1e-08 }
 0x355   : > { %2791 = vrsqrt.f32 %v1852_v61  ;;  %vm1861_vm2 = vcmp.eq.f32.partialorder %v1852_v61, inf  ;;  %v1864_v15 = vand.u32 2147483648, %v1852_v61  ;;  %vm1863_vm5 = vcmp.eq.f32.partialorder %v1852_v61, 0.0 }
 0x356   : > { %v3760_v0 = vpop.f32.mrf.mxu3 }
 0x357   : > { %v1849_v46 = vmul.f32 %v3760_v0, %v3760_v0 }
 0x359   : > { %v1851_v44 = vadd.f32 %v1849_v46, %v1847_v1 }
 0x35b   : > { %v2792_v49 = vpop.eup %2791  ;;  %v1853_v2 = vmax.f32 %v1851_v44, 1e-08 }
 0x35c   : > { %v1855_v3 = vmul.f32 %v2792_v49, %v1852_v61 }
 0x35d   : > { %2793 = vrsqrt.f32 %v1853_v2  ;;  %vm1873_vm7 = vcmp.eq.f32.partialorder %v1853_v2, inf  ;;  %v1876_v27 = vand.u32 2147483648, %v1853_v2  ;;  %vm1875_vm8 = vcmp.eq.f32.partialorder %v1853_v2, 0.0 }
 0x35e   : > { %v1856_v5 = vmul.f32 %v2792_v49, %v1855_v3  ;;  %v908_v3 = vld [vmem:[#allocation26] sm:$0xf] }
 0x35f   : > { %2586 = vmatpush.msk.msrb.mxu1 %vm968_vm3, %v908_v3  ;;  %2589 = vmatpush.msk.msrb.mxu2 %vm968_vm3, %v908_v3 }
 0x360   : > { %v1857_v59 = vmul.f32 0.5, %v1856_v5  ;;  %2592 = vmatpush.msk.msrb.mxu3 %vm968_vm3, %v908_v3 }
 0x362   : > { %v1858_v52 = vsub.f32 1.5, %v1857_v59 }
 0x363   : > { %v2794_v6 = vpop.eup %2793  ;;  %v1744_v7 = vpop.f32.mrf.mxu0 }
 0x364   : > { %v1859_v8 = vmul.f32 %v2792_v49, %v1858_v52  ;;  %v1867_v9 = vmul.f32 %v2794_v6, %v1853_v2  ;;  %v1750_v10 = vadd.f32 %v1744_v7, %v1716_v54 }
 0x366   : > { %v1860_v11 = vmul.f32 %v1859_v8, %v1852_v61  ;;  %v1868_v12 = vmul.f32 %v2794_v6, %v1867_v9  ;;  %v1922_v13 = vmax.f32 %v1750_v10, 0.0 }
 0x368   : > { %v1862_v16 = vsel %vm1861_vm2, %v1852_v61, %v1860_v11  ;;  %v1869_v17 = vmul.f32 0.5, %v1868_v12  ;;  %2581 = vmatmul.msk.f32.vlgmr.msra.gmra.mxu3 %vm1259_vm6, %v1922_v13 }
 0x369   : > { %v1865_v18 = vsel %vm1863_vm5, %v1864_v15, %v1862_v16 }
 0x36a   : > { %v2570_v20 = vmul.f32 -1.442695, %v1865_v18  ;;  %v1870_v21 = vsub.f32 1.5, %v1869_v17 }
 0x36b   : > { %v1747_v22 = vpop.f32.mrf.mxu0 }
 0x36c   : > { %2795 = vpow2.f32 %v2570_v20  ;;  %v1871_v23 = vmul.f32 %v2794_v6, %v1870_v21  ;;  %v1751_v24 = vadd.f32 %v1747_v22, %v1717_v19 }
 0x36e   : > { %v1872_v25 = vmul.f32 %v1871_v23, %v1853_v2  ;;  %v1923_v26 = vmax.f32 %v1751_v24, 0.0 }
 0x370   : > { %v1874_v28 = vsel %vm1873_vm7, %v1853_v2, %v1872_v25  ;;  %2582 = vmatmul.msk.f32.gmra.mxu3 %vm1259_vm6, %v1923_v26 }
 0x371   : > { %v1877_v29 = vsel %vm1875_vm8, %v1876_v27, %v1874_v28  ;;  %vm2237_vm8 = vcmask 195584  }
 0x372   : > { %v2796_v30 = vpop.eup %2795  ;;  %v2571_v31 = vmul.f32 -1.442695, %v1877_v29 }
 0x373   : > { %v1884_v32 = vadd.f32 1.0, %v2796_v30 }
 0x374   : > { %2797 = vpow2.f32 %v2571_v31 }
 0x375   : > { %2799 = vrcp.f32 %v1884_v32  ;;  %v1897_v38 = vand.u32 2147483648, %v1884_v32  ;;  %v1895_v40 = vand.u32 2147483647, %v1884_v32  ;;  %vm1891_vm10 = vweird.f32 %v1884_v32 }
 0x377   : > { %v1898_v43 = vor.u32 1.1754944e-38, %v1897_v38  ;;  %vm1896_vm12 = vcmp.eq.f32.partialorder %v1895_v40, 8.507059e+37 }
 0x37a   : > { %v2798_v33 = vpop.eup %2797 }
 0x37b   : > { %v2800_v34 = vpop.eup %2799  ;;  %v1885_v35 = vadd.f32 1.0, %v2798_v33 }
 0x37c   : > { %v1887_v36 = vmul.f32 %v2800_v34, %v1884_v32  ;;  %vm1892_vm9 = vweird.f32 %v2800_v34 }
 0x37d   : > { %2801 = vrcp.f32 %v1885_v35  ;;  %vm1893_vm11 = vmor %vm1891_vm10, %vm1892_vm9  ;;  %v1912_v62 = vand.u32 2147483648, %v1885_v35  ;;  %v1910_v1 = vand.u32 2147483647, %v1885_v35  ;;  %vm1906_vm14 = vweird.f32 %v1885_v35 }
 0x37e   : > { %v1888_v37 = vsub.f32 1.0, %v1887_v36  ;;  %vm2240_vm9 = vcmask 228352  }
 0x37f   : > { %v1913_v44 = vor.u32 1.1754944e-38, %v1912_v62  ;;  %vm1911_vm0 = vcmp.eq.f32.partialorder %v1910_v1, 8.507059e+37 }
 0x380   : > { %v1889_v39 = vmul.f32 %v2800_v34, %v1888_v37 }
 0x382   : > { %v1890_v41 = vadd.f32 %v2800_v34, %v1889_v39 }
 0x383   : > { %v2802_v42 = vpop.eup %2801 }
 0x384   : > { %v1894_v45 = vsel %vm1893_vm11, %v2800_v34, %v1890_v41  ;;  %v1902_v50 = vmul.f32 %v2802_v42, %v1885_v35  ;;  %vm1907_vm13 = vweird.f32 %v2802_v42 }
 0x385   : > { %v1899_v51 = vsel %vm1896_vm12, %v1898_v43, %v1894_v45  ;;  %vm1908_vm15 = vmor %vm1906_vm14, %vm1907_vm13 }
 0x386   : > { %v1916_v55 = vmul.f32 %v1899_v51, %v3742_v48  ;;  %v1918_v56 = vmul.f32 %v1899_v51, %v3740_v47  ;;  %v1920_v58 = vmul.f32 %v1899_v51, %v3748_v53  ;;  %v1903_v61 = vsub.f32 1.0, %v1902_v50  ;;  %v2770_v51 = vld [vmem:[#allocation27] ss:$0 sm:$0xff] }
 0x388   : > { %v1904_v63 = vmul.f32 %v2802_v42, %v1903_v61  ;;  %2573 = vmatmul.msk.f32.vlgmr.msra.gmra.mxu0 %vm963_vm4, %v1916_v55  ;;  %2576 = vmatmul.msk.f32.vlgmr.msra.gmra.mxu1 %vm963_vm4, %v1918_v56 }
 0x389   : > { %2579 = vmatmul.msk.f32.vlgmr.msra.gmra.mxu2 %vm963_vm4, %v1920_v58 }
 0x38a   : > { %v1905_v46 = vadd.f32 %v2802_v42, %v1904_v63 }
 0x38c   : > { %v1909_v48 = vsel %vm1908_vm15, %v2802_v42, %v1905_v46 }
 0x38d   : > { %v1914_v47 = vsel %vm1911_vm0, %v1913_v44, %v1909_v48 }
 0x38e   : > { %v1921_v53 = vmul.f32 %v1914_v47, %v3760_v0  ;;  %v1917_v49 = vmul.f32 %v1914_v47, %v3754_v60  ;;  %v1919_v2 = vmul.f32 %v1914_v47, %v3752_v57  ;;  %v911_v0 = vld [vmem:[%s3840_s22] sm:$0xf] }
 0x38f   : > { %2583 = vmatpush.msk.msrb.mxu0 %vm968_vm3, %v911_v0 }
 0x390   : > { %2574 = vmatmul.msk.f32.gmra.mxu0 %vm963_vm4, %v1917_v49  ;;  %2577 = vmatmul.msk.f32.gmra.mxu1 %vm963_vm4, %v1919_v2 }
 0x391   : > { %2580 = vmatmul.msk.f32.gmra.mxu2 %vm963_vm4, %v1921_v53 }
 0x3eb   : > { %v2073_v37 = vpop.f32.mrf.mxu3 }
 0x3ec   : > { %v2082_v61 = vadd.f32 %v2770_v51, %v2073_v37 }
 0x3f3   : > { %v2076_v39 = vpop.f32.mrf.mxu3 }
 0x3f4   : > { %v2083_v63 = vadd.f32 %v2770_v51, %v2076_v39 }
 0x405   : > { %v1950_v57 = vpop.f32.mrf.mxu0  ;;  %v1979_v60 = vpop.f32.mrf.mxu1 }
 0x406   : > { %2587 = vmatmul.msk.f32.vlgmr.msrb.gmra.mxu1 %vm963_vm4, %v1950_v57  ;;  %2590 = vmatmul.msk.f32.vlgmr.msrb.gmra.mxu2 %vm963_vm4, %v1979_v60  ;;  %v2014_v4 = vmul.f32 %v1950_v57, %v1950_v57  ;;  %v2016_v5 = vmul.f32 %v1979_v60, %v1979_v60 }
 0x408   : > { %v2018_v54 = vadd.f32 %v2016_v5, %v2014_v4 }
 0x40c   : > { %v2008_v59 = vpop.f32.mrf.mxu2 }
 0x40d   : > { %v2020_v52 = vmul.f32 %v2008_v59, %v2008_v59  ;;  %2593 = vmatmul.msk.f32.vlgmr.msrb.gmra.mxu3 %vm963_vm4, %v2008_v59  ;;  %v1953_v6 = vpop.f32.mrf.mxu0  ;;  %v1982_v7 = vpop.f32.mrf.mxu1 }
 0x40e   : > { %2588 = vmatmul.msk.f32.gmra.mxu1 %vm963_vm4, %v1953_v6  ;;  %2591 = vmatmul.msk.f32.gmra.mxu2 %vm963_vm4, %v1982_v7  ;;  %v2015_v10 = vmul.f32 %v1953_v6, %v1953_v6  ;;  %v2017_v11 = vmul.f32 %v1982_v7, %v1982_v7 }
 0x40f   : > { %v2022_v8 = vadd.f32 %v2020_v52, %v2018_v54 }
 0x410   : > { %v2019_v13 = vadd.f32 %v2017_v11, %v2015_v10 }
 0x411   : > { %v2024_v9 = vmax.f32 %v2022_v8, 1e-08 }
 0x413   : > { %2803 = vrsqrt.f32 %v2024_v9  ;;  %vm2033_vm3 = vcmp.eq.f32.partialorder %v2024_v9, inf  ;;  %v2036_v27 = vand.u32 2147483648, %v2024_v9  ;;  %vm2035_vm2 = vcmp.eq.f32.partialorder %v2024_v9, 0.0 }
 0x414   : > { %v2011_v12 = vpop.f32.mrf.mxu2 }
 0x415   : > { %v2021_v14 = vmul.f32 %v2011_v12, %v2011_v12  ;;  %2594 = vmatmul.msk.f32.gmra.mxu3 %vm963_vm4, %v2011_v12 }
 0x417   : > { %v2023_v15 = vadd.f32 %v2021_v14, %v2019_v13 }
 0x419   : > { %v2804_v16 = vpop.eup %2803  ;;  %v2025_v17 = vmax.f32 %v2023_v15, 1e-08 }
 0x41a   : > { %v2027_v18 = vmul.f32 %v2804_v16, %v2024_v9 }
 0x41b   : > { %2805 = vrsqrt.f32 %v2025_v17  ;;  %vm2045_vm5 = vcmp.eq.f32.partialorder %v2025_v17, inf  ;;  %v2048_v34 = vand.u32 2147483648, %v2025_v17  ;;  %vm2047_vm7 = vcmp.eq.f32.partialorder %v2025_v17, 0.0 }
 0x41c   : > { %v2028_v19 = vmul.f32 %v2804_v16, %v2027_v18 }
 0x41e   : > { %v2029_v20 = vmul.f32 0.5, %v2028_v19 }
 0x420   : > { %v2030_v21 = vsub.f32 1.5, %v2029_v20 }
 0x421   : > { %v2806_v22 = vpop.eup %2805 }
 0x422   : > { %v2031_v23 = vmul.f32 %v2804_v16, %v2030_v21  ;;  %v2039_v24 = vmul.f32 %v2806_v22, %v2025_v17 }
 0x424   : > { %v2032_v25 = vmul.f32 %v2031_v23, %v2024_v9  ;;  %v2040_v26 = vmul.f32 %v2806_v22, %v2039_v24 }
 0x426   : > { %v2034_v28 = vsel %vm2033_vm3, %v2024_v9, %v2032_v25  ;;  %v2041_v29 = vmul.f32 0.5, %v2040_v26 }
 0x427   : > { %v2037_v30 = vsel %vm2035_vm2, %v2036_v27, %v2034_v28 }
 0x428   : > { %2584 = vmatmul.msk.f32.vlgmr.msrb.gmra.mxu0 %vm963_vm4, %v2037_v30  ;;  %v2042_v31 = vsub.f32 1.5, %v2041_v29 }
 0x42a   : > { %v2043_v32 = vmul.f32 %v2806_v22, %v2042_v31 }
 0x42c   : > { %v2044_v33 = vmul.f32 %v2043_v32, %v2025_v17 }
 0x42e   : > { %v2046_v35 = vsel %vm2045_vm5, %v2025_v17, %v2044_v33 }
 0x42f   : > { %v2049_v36 = vsel %vm2047_vm7, %v2048_v34, %v2046_v35 }
 0x430   : > { %2585 = vmatmul.msk.f32.gmra.mxu0 %vm963_vm4, %v2049_v36  ;;  %vm2234_vm4 = vcmask 162816  }
 0x483   : > { %v2144_v38 = vpop.f32.mrf.mxu1 }
 0x484   : > { %2210 = vrot.lane.b32.xlu0 %v2144_v38, %s3299_s27 }
 0x489   : > { %v2173_v40 = vpop.f32.mrf.mxu2 }
 0x48a   : > { %2218 = vrot.lane.b32.xlu2 %v2173_v40, %s3300_s14 }
 0x48b   : > { %v2147_v41 = vpop.f32.mrf.mxu1 }
 0x48c   : > { %2212 = vrot.lane.b32.xlu1 %v2147_v41, %s3299_s27 }
 0x490   : > { %v2202_v42 = vpop.f32.mrf.mxu3 }
 0x491   : > { %v2176_v43 = vpop.f32.mrf.mxu2 }
 0x492   : > { %2220 = vrot.lane.b32.xlu0 %v2176_v43, %s3300_s14 }
 0x494   : > { %2226 = vrot.lane.b32.xlu1 %v2202_v42, %s3301_s5 }
 0x498   : > { %v2205_v45 = vpop.f32.mrf.mxu3 }
 0x499   : > { %2228 = vrot.lane.b32.xlu2 %v2205_v45, %s3301_s5 }
 0x4a5   : > { %v2110_v50 = vpop.f32.mrf.mxu0 }
 0x4a6   : > { %v2116_v1 = vadd.f32 %v2110_v50, %v2082_v61 }
 0x4ad   : > { %v2113_v62 = vpop.f32.mrf.mxu0 }
 0x4ae   : > { %v2117_v46 = vadd.f32 %v2113_v62, %v2083_v63 }
 0x4e4   : > { %v2219_v56 = vpop.permute.xlu2 %2218 }
 0x4f3   : > { %v2229_v53 = vpop.permute.xlu2 %2228 }
 0x4f6   : > { %v2211_v55 = vpop.permute.xlu0 %2210 }
 0x4f7   : > { %v2232_v44 = vsel %vm1259_vm6, %v2116_v1, %v2211_v55 }
 0x4f8   : > { %v2235_v3 = vsel %vm2234_vm4, %v2232_v44, %v2219_v56 }
 0x4fe   : > { %v2213_v58 = vpop.permute.xlu1 %2212 }
 0x4ff   : > { %v2233_v48 = vsel %vm1259_vm6, %v2117_v46, %v2213_v58 }
 0x504   : > { %v2221_v47 = vpop.permute.xlu0 %2220 }
 0x505   : > { %v2236_v49 = vsel %vm2234_vm4, %v2233_v48, %v2221_v47 }
 0x506   : > { %v2239_v2 = vsel %vm2237_vm8, %v2236_v49, %v2229_v53  ;;  %v2227_v0 = vpop.permute.xlu1 %2226 }
 0x507   : > { %v2238_v57 = vsel %vm2237_vm8, %v2235_v3, %v2227_v0  ;;  %2242 = vst.msk [vmem:[#allocation5 + $0x8] sm:$0xff] %vm2240_vm9, %v2239_v2 }
 0x508   : > { %2241 = vst.msk [vmem:[#allocation5] sm:$0xff] %vm2240_vm9, %v2238_v57 }
 0x509 LB: >> { %s2250_s28 = sadd.s32 %s3276_s6, %s2499_s2  ;;  %s2256_s4 = scalar_lea.vmem [#allocation5], %s3276_s6  ;;  %s3276_s6 = sphi %s3274_s6, %s2248_s6  }
 0x50a   : >> { %s2251_s10 = sld [smem:[#allocation8 + %s2250_s28]]  ;;  %p2252_p9 = scmp.lt.s32.totalorder %s2250_s28, 40 }
 0x50b   : >> { %s2248_s6 = sadd.s32 1, %s3276_s6  }
 0x50c   : >> { %s2253_s26 = scalar_select %p2252_p9, 1.0, 0.0 }
 0x50d   : >> { %p2245_p10 = scmp.ge.s32.totalorder %s2248_s6, 16  }
 0x50e   : >> { %v2258_v4 = vstv %s2253_s26  ;;  %p2596_p11 = scmp.ne.s32.totalorder (%p2245_p10), %s3446_s25, 2 }
 0x50f   : >> { %v2257_v60 = vld [vmem:[%s2256_s4] sm:$0x1] }
 0x510   : >> { %v2259_v5 = vmul.f32 %v2258_v4, %v2257_v60  ;;  %s2254_s1 = scalar_lea.vmem [#allocation2], %s2251_s10  ;;  %2247 = sbr.rel (!%p2245_p10) target bundleno = 1289 (0x509), region = 223 }
 0x511   : >> { %v2255_v59 = vld [vmem:[%s2254_s1] sm:$0x1] }
 0x512   : >> { %v2260_v54 = vadd.f32 %v2259_v5, %v2255_v59 }
 0x514   : >> { %2262 = vst.msk [vmem:[%s2254_s1] sm:$0x1] %vm882_vm1, %v2260_v54 }
 0x515   : > { %2266 = sbr.rel (%p2596_p11) target bundleno = 1434 (0x59a), region = 178  ;;  %s3874_s16 = sld [smem:[#allocation42_spill]] (!%p2596_p11) }
 0x51a   : > { %v3302_v6 = vmov 0  }
 0x51b   : > { %v2269_v52 = vld [vmem:[%s3874_s16] sm:$0xff]  ;;  %2807 = vset.pattern.permute.xlu0 %v3302_v6  ;;  %v2270_v7 = vld [vmem:[%s3874_s16 + $0x8] sm:$0xff] }
 0x51c   : > { %2273 = vperm.xlu0 %2807, %v2269_v52   ;;  %v2267_v8 = vld [vmem:[#allocation2] sm:$0xff]  ;;  %v2268_v11 = vld [vmem:[#allocation2 + $0x8] sm:$0xff] }
 0x524   : > { %2278 = vperm.xlu0 %2807, %v2270_v7  }
 0x58e   : > { %v2274_v9 = vpop.permute.xlu0 %2273 }
 0x58f   : > { %v2281_v10 = vmul.f32 %v2274_v9, %v2267_v8 }
 0x591   : > { %2283 = vst.msk [vmem:[#allocation29] sm:$0xff] %vm2240_vm9, %v2281_v10 }
 0x596   : > { %v2279_v12 = vpop.permute.xlu0 %2278 }
 0x597   : > { %v2282_v13 = vmul.f32 %v2279_v12, %v2268_v11 }
 0x599   : > { %2284 = vst.msk [vmem:[#allocation29 + $0x8] sm:$0xff] %vm2240_vm9, %v2282_v13 }
 0x59a PF: > { %p2714_p12 = scmp.eq.s32.totalorder %s3446_s25, 2  ;;  %s3303_s2 = smov [#allocation29]  }
 0x59b   : > { %s2290_s5 = sshll.u32 %s3303_s2, 4  ;;  %s2292_s10 = sshll.u32 %s3842_s24, 4  ;;  %s2291_s5 = int_to_ptr.vmem [resolvable:$true] %s2290_s5  ;;  %s2293_s10 = int_to_ptr.hbm [resolvable:$true] %s2292_s10 }
 0x59c   : > { %s3304_s26 = smov 128   ;;  %s3305_s4 = smov 8  }
 0x59d   : > { %2650 = dma.vmem_to_hbm [thread:$0]  (%p2714_p12), %s2291_s5, 256, %s2293_s10, [#allocation11], %s3304_s26, %s3304_s26, %s3305_s4  }
 0x59e   : > { %3263 = dma.done.wait (%p2714_p12), [#allocation11], 256  }
 0x59f   : > { %3265 = vsyncadd (%p2714_p12), [#allocation11], 4294967040 }
 0x5a0 PF: > { %s55_s8 = sadd.s32 1, %s3268_s8  }
 0x5a1   : > { %p52_p13 = scmp.ge.s32.totalorder %s55_s8, 5  }
 0x5a3   :  { %54 = sbr.rel (!%p52_p13) target bundleno = 33 (0x21), region = 234 }
 0x5a8   :  { %2309 = vsyncpa [#allocation10], 1 }
 0x5a9   :  { %2311 = vsyncpa [#allocation10 + $0x1], 1 }
 0x5aa   :  { %2312 = vsyncpa [#allocation13], 1 }
 0x5ab   :  { %2313 = vsyncpa [#allocation16], 1 }
 0x5ac   :  { %2314 = vsyncpa [#allocation19], 1 }
 0x5ad   :  { %2315 = vsyncpa [#allocation22], 1 }
 0x5ae   :  { %2316 = vsyncpa [#allocation25], 1 }
 0x5af   :  { %2317 = vsyncpa [#allocation28], 1 }
 0x5b0   :  { %2318 = vsyncpa [#allocation11], 1 }
 0x5b1   :  { %2320 = vsyncpa [#allocation11 + $0x1], 1 }

</bundles_post_ra>
